<compile_context>
chip_gen: v7x
topology: tpu7x:2x2x1
jax: 0.10.0
libtpu: 0.0.40
codegen_flags: <defaults>
</compile_context>

<pallas_src>
import functools

import jax
import jax.numpy as jnp
import numpy as np
from jax.experimental import pallas as pl
from jax.experimental.pallas import tpu as pltpu


# ----------------------------------------------------------------------------
# Pallas kernel: one grid iteration == TB decoder time steps.
# ----------------------------------------------------------------------------
def decoder_block_kernel(
    emb_ref,     # [TB, B, E]   prev target embeddings for this block of steps
    encp_ref,    # [B, S, H]    encoder_output @ Wa^T  (precomputed, resident)
    enc_ref,     # [B, S, 2H]   encoder outputs (resident)
    h0_ref,      # [B, H]       tanh(init_hidden(encoder_final))
    wih_e_ref,   # [3, E, H]    GRU W_ih (emb part), gates stacked (r,z,n), transposed
    wih_c_ref,   # [3, 2H, H]   GRU W_ih (context part), per gate, transposed
    whh_ref,     # [3, H, H]    GRU W_hh per gate, transposed
    bih_ref,     # [3, 1, H]    GRU b_ih per gate
    bhh_ref,     # [3, 1, H]    GRU b_hh per gate
    wg_e_ref,    # [E, H]       g weight, emb columns, transposed
    wg_h_ref,    # [H, H]       g weight, f_output columns, transposed
    wg_c_ref,    # [2H, H]      g weight, context columns, transposed
    out_ref,     # [TB, B, H]   decoder outputs for this block of steps
    hfin_ref,    # [B, H]       final hidden state (resident, written on last block)
    h_scr,       # VMEM [B, H]  recurrent hidden state carried across grid blocks
    *, tb, t_total,
):
    blk = pl.program_id(0)

    @pl.when(blk == 0)
    def _():
        h_scr[...] = h0_ref[...]

    # ---- loop-invariant loads, hoisted out of the per-step loop -------------
    encp = encp_ref[...]                       # [B, S, H]
    enc = enc_ref[...]                         # [B, S, 2H]
    wih_e_r, wih_e_z, wih_e_n = wih_e_ref[0], wih_e_ref[1], wih_e_ref[2]
    wih_c_r, wih_c_z, wih_c_n = wih_c_ref[0], wih_c_ref[1], wih_c_ref[2]
    whh_r, whh_z, whh_n = whh_ref[0], whh_ref[1], whh_ref[2]
    b_r = bih_ref[0] + bhh_ref[0]              # [1, H]
    b_z = bih_ref[1] + bhh_ref[1]              # [1, H]
    bih_n = bih_ref[2]                         # [1, H]
    bhh_n = bhh_ref[2]                         # [1, H]
    wg_e = wg_e_ref[...]
    wg_h = wg_h_ref[...]
    wg_c = wg_c_ref[...]

    def dot(a, b):
        return jnp.dot(a, b, preferred_element_type=jnp.float32)

    def step(j, h):
        emb = emb_ref[j]                                             # [B, E]

        # --- attention on pre-projected encoder states (MXU contractions) ---
        h3 = h[:, None, :]                                           # [B, 1, H]
        scores = jnp.einsum("bqh,bsh->bqs", h3, encp,
                            preferred_element_type=jnp.float32)      # [B, 1, S]
        m = jnp.max(scores, axis=-1, keepdims=True)
        e = jnp.exp(scores - m)
        denom = jnp.sum(e, axis=-1, keepdims=True)                   # [B, 1, 1]
        ctx3 = jnp.einsum("bqs,bsf->bqf", e, enc,
                          preferred_element_type=jnp.float32)        # [B, 1, 2H]
        ctx = (ctx3 / denom)[:, 0, :]                                # [B, 2H]

        # --- GRU cell (torch gate order r,z,n); split weights, no concats ---
        r = jax.nn.sigmoid(dot(emb, wih_e_r) + dot(ctx, wih_c_r)
                           + dot(h, whh_r) + b_r)
        z = jax.nn.sigmoid(dot(emb, wih_e_z) + dot(ctx, wih_c_z)
                           + dot(h, whh_z) + b_z)
        gi_n = dot(emb, wih_e_n) + dot(ctx, wih_c_n) + bih_n
        gh_n = dot(h, whh_n) + bhh_n
        n = jnp.tanh(gi_n + r * gh_n)
        h_new = (1.0 - z) * n + z * h                                # [B, H]

        # --- g projection (dropout == identity at inference), no concat -----
        out_ref[j] = dot(emb, wg_e) + dot(h_new, wg_h) + dot(ctx, wg_c)

        # Freeze the recurrence on padded (t >= T) steps, if any exist.
        if t_total % tb != 0:
            t_global = blk * tb + j
            h_new = jnp.where(t_global < t_total, h_new, h)
        return h_new

    h_final = jax.lax.fori_loop(0, tb, step, h_scr[...], unroll=True)
    h_scr[...] = h_final

    @pl.when(blk == pl.num_programs(0) - 1)
    def _():
        hfin_ref[...] = h_final


# ----------------------------------------------------------------------------
# Wrapper: loop-invariant precompute, weight splitting, pallas_call plumbing.
# ----------------------------------------------------------------------------
@functools.partial(jax.jit, static_argnames=("block_t",))
def decoder_forward(target_embedding, encoder_output, encoder_final, params,
                    block_t=4):
    """Mirrors Decoder.forward(target_embedding, encoder_output, encoder_final).

    target_embedding: [B, T, E]
    encoder_output  : [B, S, 2H]
    encoder_final   : [1, B, 2H]   (num_layers=1)
    returns (output [B, T, H], decoder_hidden [1, B, H])
    """
    B, T, E = target_embedding.shape
    _, S, twoH = encoder_output.shape
    H = twoH // 2

    TB = min(block_t, T)
    num_blocks = (T + TB - 1) // TB
    T_pad = num_blocks * TB

    emb_tm = jnp.transpose(target_embedding, (1, 0, 2))        # [T, B, E]
    if T_pad != T:
        emb_tm = jnp.pad(emb_tm, ((0, T_pad - T), (0, 0), (0, 0)))

    # One-time init-hidden and attention projection (loop invariant).
    encf = encoder_final[0]                                    # [B, 2H]
    h0 = jnp.tanh(encf @ params["init_w"].T + params["init_b"][None, :])
    wa = params["attn_w"]                                      # [H, 2H]
    enc_proj = jnp.einsum("bsf,hf->bsh", encoder_output, wa)   # [B, S, H]

    # Split GRU weights per gate (r,z,n) and per input (emb / context);
    # transpose for right-multiplication.  Biases per gate.
    w_ih = params["gru_w_ih"]                                  # [3H, E+2H]
    w_hh = params["gru_w_hh"]                                  # [3H, H]
    wih_e = jnp.stack([w_ih[g * H:(g + 1) * H, :E].T for g in range(3)])   # [3,E,H]
    wih_c = jnp.stack([w_ih[g * H:(g + 1) * H, E:].T for g in range(3)])   # [3,2H,H]
    whh = jnp.stack([w_hh[g * H:(g + 1) * H, :].T for g in range(3)])      # [3,H,H]
    bih3 = params["gru_b_ih"].reshape(3, 1, H)
    bhh3 = params["gru_b_hh"].reshape(3, 1, H)

    # Split g weight by the concat layout [emb(E), f_output(H), context(2H)].
    g_w = params["g_w"]                                        # [H, E+3H]
    wg_e = g_w[:, :E].T                                        # [E, H]
    wg_h = g_w[:, E:E + H].T                                   # [H, H]
    wg_c = g_w[:, E + H:].T                                    # [2H, H]

    kernel = functools.partial(decoder_block_kernel, tb=TB, t_total=T)

    def full(shape):
        return pl.BlockSpec(shape, lambda i: (0,) * len(shape))

    grid_spec = pltpu.PrefetchScalarGridSpec(
        num_scalar_prefetch=0,
        grid=(num_blocks,),
        in_specs=[
            pl.BlockSpec((TB, B, E), lambda i: (i, 0, 0)),     # emb (per block)
            full((B, S, H)),                                   # enc_proj
            full((B, S, twoH)),                                # encoder_output
            full((B, H)),                                      # h0
            full((3, E, H)),                                   # W_ih (emb part)
            full((3, twoH, H)),                                # W_ih (ctx part)
            full((3, H, H)),                                   # W_hh
            full((3, 1, H)),                                   # b_ih
            full((3, 1, H)),                                   # b_hh
            full((E, H)),                                      # Wg (emb cols)
            full((H, H)),                                      # Wg (h cols)
            full((twoH, H)),                                   # Wg (ctx cols)
        ],
        out_specs=[
            pl.BlockSpec((TB, B, H), lambda i: (i, 0, 0)),     # per-block outputs
            full((B, H)),                                      # final hidden
        ],
        scratch_shapes=[pltpu.VMEM((B, H), jnp.float32)],
    )

    out_tm, h_fin = pl.pallas_call(
        kernel,
        out_shape=(
            jax.ShapeDtypeStruct((T_pad, B, H), jnp.float32),
            jax.ShapeDtypeStruct((B, H), jnp.float32),
        ),
        grid_spec=grid_spec,
        compiler_params=pltpu.CompilerParams(
            dimension_semantics=("arbitrary",)),               # sequential recurrence
    )(emb_tm, enc_proj, encoder_output, h0,
      wih_e, wih_c, whh, bih3, bhh3, wg_e, wg_h, wg_c)

    output = jnp.transpose(out_tm[:T], (1, 0, 2))              # [B, T, H]
    decoder_hidden = h_fin[None]                               # [1, B, H]
    return output, decoder_hidden


# ----------------------------------------------------------------------------
# Pure-JAX reference (PyTorch-equivalent math) for a correctness check.
# ----------------------------------------------------------------------------
def decoder_forward_ref(target_embedding, encoder_output, encoder_final, params):
    B, T, E = target_embedding.shape
    H = encoder_output.shape[-1] // 2
    h = jnp.tanh(encoder_final[0] @ params["init_w"].T + params["init_b"])
    outs = []
    for i in range(T):
        emb = target_embedding[:, i]
        h_w = h @ params["attn_w"]
        scores = jnp.einsum("bf,bsf->bs", h_w, encoder_output)
        attn = jax.nn.softmax(scores, axis=-1)
        ctx = jnp.einsum("bs,bsf->bf", attn, encoder_output)
        x = jnp.concatenate([emb, ctx], axis=-1)
        gi = x @ params["gru_w_ih"].T + params["gru_b_ih"]
        gh = h @ params["gru_w_hh"].T + params["gru_b_hh"]
        r = jax.nn.sigmoid(gi[:, :H] + gh[:, :H])
        z = jax.nn.sigmoid(gi[:, H:2 * H] + gh[:, H:2 * H])
        n = jnp.tanh(gi[:, 2 * H:] + r * gh[:, 2 * H:])
        h = (1.0 - z) * n + z * h
        g_in = jnp.concatenate([emb, h, ctx], axis=-1)
        outs.append(g_in @ params["g_w"].T)
    return jnp.stack(outs, axis=1), h[None]


# ----------------------------------------------------------------------------
def make_params(key, embedding_size, hidden_size):
    E, H = embedding_size, hidden_size
    ks = jax.random.split(key, 8)
    u = lambda k, shape, fan: jax.random.uniform(
        k, shape, jnp.float32, -1.0 / np.sqrt(fan), 1.0 / np.sqrt(fan))
    return {
        "attn_w":   u(ks[0], (H, 2 * H), 2 * H),             # Attention Linear(2H->H, no bias)
        "gru_w_ih": u(ks[1], (3 * H, E + 2 * H), H),          # nn.GRU weight_ih_l0
        "gru_w_hh": u(ks[2], (3 * H, H), H),                  # nn.GRU weight_hh_l0
        "gru_b_ih": u(ks[3], (3 * H,), H),
        "gru_b_hh": u(ks[4], (3 * H,), H),
        "g_w":      u(ks[5], (H, 3 * H + E), 3 * H + E),      # g: Linear(E+3H -> H, no bias)
        "init_w":   u(ks[6], (H, 2 * H), 2 * H),              # init_hidden: Linear(2H -> H)
        "init_b":   u(ks[7], (H,), 2 * H),
    }


if __name__ == "__main__":
    B, T, S = 2, 6, 8           # batch, target len, source len (T not multiple of TB)
    E, H = 16, 32               # embedding_size, hidden_size

    key = jax.random.PRNGKey(0)
    k_emb, k_enc, k_fin, k_par = jax.random.split(key, 4)

    target_embedding = jax.random.normal(k_emb, (B, T, E), jnp.float32)
    encoder_output = jax.random.normal(k_enc, (B, S, 2 * H), jnp.float32)
    encoder_final = jax.random.normal(k_fin, (1, B, 2 * H), jnp.float32)
    params = make_params(k_par, E, H)

    out, hidden = decoder_forward(target_embedding, encoder_output,
                                  encoder_final, params, block_t=4)
    jax.block_until_ready((out, hidden))

    out_ref, hidden_ref = decoder_forward_ref(target_embedding, encoder_output,
                                              encoder_final, params)
    np.testing.assert_allclose(np.asarray(out), np.asarray(out_ref),
                               rtol=1e-4, atol=1e-4)
    np.testing.assert_allclose(np.asarray(hidden), np.asarray(hidden_ref),
                               rtol=1e-4, atol=1e-4)

    assert out.shape == (B, T, H) and hidden.shape == (1, B, H)
    print("KERNEL_OK")
</pallas_src>

<mosaic_0001>
module attributes {stable_mosaic.version = 11 : i64} {
  func.func @decoder_block_kernel(%arg0: i32, %arg1: memref<4x2x16xf32, #tpu.memory_space<vmem>>, %arg2: memref<2x8x32xf32, #tpu.memory_space<vmem>>, %arg3: memref<2x8x64xf32, #tpu.memory_space<vmem>>, %arg4: memref<2x32xf32, #tpu.memory_space<vmem>>, %arg5: memref<3x16x32xf32, #tpu.memory_space<vmem>>, %arg6: memref<3x64x32xf32, #tpu.memory_space<vmem>>, %arg7: memref<3x32x32xf32, #tpu.memory_space<vmem>>, %arg8: memref<3x1x32xf32, #tpu.memory_space<vmem>>, %arg9: memref<3x1x32xf32, #tpu.memory_space<vmem>>, %arg10: memref<16x32xf32, #tpu.memory_space<vmem>>, %arg11: memref<32x32xf32, #tpu.memory_space<vmem>>, %arg12: memref<64x32xf32, #tpu.memory_space<vmem>>, %arg13: memref<4x2x32xf32, #tpu.memory_space<vmem>>, %arg14: memref<2x32xf32, #tpu.memory_space<vmem>>, %arg15: memref<2x32xf32, #tpu.memory_space<vmem>>) attributes {dimension_semantics = [#tpu.dimension_semantics<arbitrary>], iteration_bounds = array<i64: 2>, scalar_prefetch = 0 : i64, scratch_operands = 1 : i64, tpu.core_type = #tpu.core_type<tc>, window_params = [{transform_indices = @transform_0, window_bounds = array<i64: 4, 2, 16>}, {pipeline_mode = #tpu.pipeline_mode<synchronous>, transform_indices = @transform_1, window_bounds = array<i64: 2, 8, 32>}, {pipeline_mode = #tpu.pipeline_mode<synchronous>, transform_indices = @transform_2, window_bounds = array<i64: 2, 8, 64>}, {pipeline_mode = #tpu.pipeline_mode<synchronous>, transform_indices = @transform_3, window_bounds = array<i64: 2, 32>}, {pipeline_mode = #tpu.pipeline_mode<synchronous>, transform_indices = @transform_4, window_bounds = array<i64: 3, 16, 32>}, {pipeline_mode = #tpu.pipeline_mode<synchronous>, transform_indices = @transform_5, window_bounds = array<i64: 3, 64, 32>}, {pipeline_mode = #tpu.pipeline_mode<synchronous>, transform_indices = @transform_6, window_bounds = array<i64: 3, 32, 32>}, {pipeline_mode = #tpu.pipeline_mode<synchronous>, transform_indices = @transform_7, window_bounds = array<i64: 3, 1, 32>}, {pipeline_mode = #tpu.pipeline_mode<synchronous>, transform_indices = @transform_8, window_bounds = array<i64: 3, 1, 32>}, {pipeline_mode = #tpu.pipeline_mode<synchronous>, transform_indices = @transform_9, window_bounds = array<i64: 16, 32>}, {pipeline_mode = #tpu.pipeline_mode<synchronous>, transform_indices = @transform_10, window_bounds = array<i64: 32, 32>}, {pipeline_mode = #tpu.pipeline_mode<synchronous>, transform_indices = @transform_11, window_bounds = array<i64: 64, 32>}, {transform_indices = @transform_12, window_bounds = array<i64: 4, 2, 32>}, {pipeline_mode = #tpu.pipeline_mode<synchronous>, transform_indices = @transform_13, window_bounds = array<i64: 2, 32>}]} {
    %c0_i32 = arith.constant 0 : i32
    %0 = arith.cmpi eq, %arg0, %c0_i32 : i32
    %1 = arith.extui %0 : i1 to i32
    %c0_i32_0 = arith.constant 0 : i32
    %2 = arith.cmpi ne, %1, %c0_i32_0 : i32
    scf.if %2 {
      %c0_160 = arith.constant 0 : index
      %c0_161 = arith.constant 0 : index
      %321 = vector.load %arg4[%c0_160, %c0_161] : memref<2x32xf32, #tpu.memory_space<vmem>>, vector<2x32xf32>
      %c0_162 = arith.constant 0 : index
      %c0_163 = arith.constant 0 : index
      %322 = vector.load %arg15[%c0_162, %c0_163] : memref<2x32xf32, #tpu.memory_space<vmem>>, vector<2x32xf32>
      tpu.vector_store %arg15[%c0_162, %c0_163], %321 {strides = array<i32>} : memref<2x32xf32, #tpu.memory_space<vmem>>, vector<2x32xf32>,
    } else {
    }
    %c0 = arith.constant 0 : index
    %c0_1 = arith.constant 0 : index
    %c0_2 = arith.constant 0 : index
    %3 = vector.load %arg2[%c0, %c0_1, %c0_2] : memref<2x8x32xf32, #tpu.memory_space<vmem>>, vector<2x8x32xf32>
    %c0_3 = arith.constant 0 : index
    %c0_4 = arith.constant 0 : index
    %c0_5 = arith.constant 0 : index
    %4 = vector.load %arg3[%c0_3, %c0_4, %c0_5] : memref<2x8x64xf32, #tpu.memory_space<vmem>>, vector<2x8x64xf32>
    %c0_6 = arith.constant 0 : index
    %c0_7 = arith.constant 0 : index
    %c0_8 = arith.constant 0 : index
    %5 = vector.load %arg5[%c0_6, %c0_7, %c0_8] : memref<3x16x32xf32, #tpu.memory_space<vmem>>, vector<1x16x32xf32>
    %6 = vector.shape_cast %5 : vector<1x16x32xf32> to vector<16x32xf32>
    %c1 = arith.constant 1 : index
    %c0_9 = arith.constant 0 : index
    %c0_10 = arith.constant 0 : index
    %7 = vector.load %arg5[%c1, %c0_9, %c0_10] : memref<3x16x32xf32, #tpu.memory_space<vmem>>, vector<1x16x32xf32>
    %8 = vector.shape_cast %7 : vector<1x16x32xf32> to vector<16x32xf32>
    %c2 = arith.constant 2 : index
    %c0_11 = arith.constant 0 : index
    %c0_12 = arith.constant 0 : index
    %9 = vector.load %arg5[%c2, %c0_11, %c0_12] : memref<3x16x32xf32, #tpu.memory_space<vmem>>, vector<1x16x32xf32>
    %10 = vector.shape_cast %9 : vector<1x16x32xf32> to vector<16x32xf32>
    %c0_13 = arith.constant 0 : index
    %c0_14 = arith.constant 0 : index
    %c0_15 = arith.constant 0 : index
    %11 = vector.load %arg6[%c0_13, %c0_14, %c0_15] : memref<3x64x32xf32, #tpu.memory_space<vmem>>, vector<1x64x32xf32>
    %12 = vector.shape_cast %11 : vector<1x64x32xf32> to vector<64x32xf32>
    %c1_16 = arith.constant 1 : index
    %c0_17 = arith.constant 0 : index
    %c0_18 = arith.constant 0 : index
    %13 = vector.load %arg6[%c1_16, %c0_17, %c0_18] : memref<3x64x32xf32, #tpu.memory_space<vmem>>, vector<1x64x32xf32>
    %14 = vector.shape_cast %13 : vector<1x64x32xf32> to vector<64x32xf32>
    %c2_19 = arith.constant 2 : index
    %c0_20 = arith.constant 0 : index
    %c0_21 = arith.constant 0 : index
    %15 = vector.load %arg6[%c2_19, %c0_20, %c0_21] : memref<3x64x32xf32, #tpu.memory_space<vmem>>, vector<1x64x32xf32>
    %16 = vector.shape_cast %15 : vector<1x64x32xf32> to vector<64x32xf32>
    %c0_22 = arith.constant 0 : index
    %c0_23 = arith.constant 0 : index
    %c0_24 = arith.constant 0 : index
    %17 = vector.load %arg7[%c0_22, %c0_23, %c0_24] : memref<3x32x32xf32, #tpu.memory_space<vmem>>, vector<1x32x32xf32>
    %18 = vector.shape_cast %17 : vector<1x32x32xf32> to vector<32x32xf32>
    %c1_25 = arith.constant 1 : index
    %c0_26 = arith.constant 0 : index
    %c0_27 = arith.constant 0 : index
    %19 = vector.load %arg7[%c1_25, %c0_26, %c0_27] : memref<3x32x32xf32, #tpu.memory_space<vmem>>, vector<1x32x32xf32>
    %20 = vector.shape_cast %19 : vector<1x32x32xf32> to vector<32x32xf32>
    %c2_28 = arith.constant 2 : index
    %c0_29 = arith.constant 0 : index
    %c0_30 = arith.constant 0 : index
    %21 = vector.load %arg7[%c2_28, %c0_29, %c0_30] : memref<3x32x32xf32, #tpu.memory_space<vmem>>, vector<1x32x32xf32>
    %22 = vector.shape_cast %21 : vector<1x32x32xf32> to vector<32x32xf32>
    %c0_31 = arith.constant 0 : index
    %c0_32 = arith.constant 0 : index
    %c0_33 = arith.constant 0 : index
    %23 = vector.load %arg8[%c0_31, %c0_32, %c0_33] : memref<3x1x32xf32, #tpu.memory_space<vmem>>, vector<1x1x32xf32>
    %24 = vector.shape_cast %23 : vector<1x1x32xf32> to vector<1x32xf32>
    %c0_34 = arith.constant 0 : index
    %c0_35 = arith.constant 0 : index
    %c0_36 = arith.constant 0 : index
    %25 = vector.load %arg9[%c0_34, %c0_35, %c0_36] : memref<3x1x32xf32, #tpu.memory_space<vmem>>, vector<1x1x32xf32>
    %26 = vector.shape_cast %25 : vector<1x1x32xf32> to vector<1x32xf32>
    %27 = arith.addf %24, %26 : vector<1x32xf32>
    %c1_37 = arith.constant 1 : index
    %c0_38 = arith.constant 0 : index
    %c0_39 = arith.constant 0 : index
    %28 = vector.load %arg8[%c1_37, %c0_38, %c0_39] : memref<3x1x32xf32, #tpu.memory_space<vmem>>, vector<1x1x32xf32>
    %29 = vector.shape_cast %28 : vector<1x1x32xf32> to vector<1x32xf32>
    %c1_40 = arith.constant 1 : index
    %c0_41 = arith.constant 0 : index
    %c0_42 = arith.constant 0 : index
    %30 = vector.load %arg9[%c1_40, %c0_41, %c0_42] : memref<3x1x32xf32, #tpu.memory_space<vmem>>, vector<1x1x32xf32>
    %31 = vector.shape_cast %30 : vector<1x1x32xf32> to vector<1x32xf32>
    %32 = arith.addf %29, %31 : vector<1x32xf32>
    %c2_43 = arith.constant 2 : index
    %c0_44 = arith.constant 0 : index
    %c0_45 = arith.constant 0 : index
    %33 = vector.load %arg8[%c2_43, %c0_44, %c0_45] : memref<3x1x32xf32, #tpu.memory_space<vmem>>, vector<1x1x32xf32>
    %34 = vector.shape_cast %33 : vector<1x1x32xf32> to vector<1x32xf32>
    %c2_46 = arith.constant 2 : index
    %c0_47 = arith.constant 0 : index
    %c0_48 = arith.constant 0 : index
    %35 = vector.load %arg9[%c2_46, %c0_47, %c0_48] : memref<3x1x32xf32, #tpu.memory_space<vmem>>, vector<1x1x32xf32>
    %36 = vector.shape_cast %35 : vector<1x1x32xf32> to vector<1x32xf32>
    %c0_49 = arith.constant 0 : index
    %c0_50 = arith.constant 0 : index
    %37 = vector.load %arg10[%c0_49, %c0_50] : memref<16x32xf32, #tpu.memory_space<vmem>>, vector<16x32xf32>
    %c0_51 = arith.constant 0 : index
    %c0_52 = arith.constant 0 : index
    %38 = vector.load %arg11[%c0_51, %c0_52] : memref<32x32xf32, #tpu.memory_space<vmem>>, vector<32x32xf32>
    %c0_53 = arith.constant 0 : index
    %c0_54 = arith.constant 0 : index
    %39 = vector.load %arg12[%c0_53, %c0_54] : memref<64x32xf32, #tpu.memory_space<vmem>>, vector<64x32xf32>
    %c0_55 = arith.constant 0 : index
    %c0_56 = arith.constant 0 : index
    %40 = vector.load %arg15[%c0_55, %c0_56] : memref<2x32xf32, #tpu.memory_space<vmem>>, vector<2x32xf32>
    %c0_i32_57 = arith.constant 0 : i32
    %41 = arith.index_cast %c0_i32_57 : i32 to index
    %c0_58 = arith.constant 0 : index
    %c0_59 = arith.constant 0 : index
    %42 = vector.load %arg1[%41, %c0_58, %c0_59] : memref<4x2x16xf32, #tpu.memory_space<vmem>>, vector<1x2x16xf32>
    %43 = vector.shape_cast %42 : vector<1x2x16xf32> to vector<2x16xf32>
    %44 = vector.shape_cast %40 : vector<2x32xf32> to vector<2x1x32xf32>
    "tpu.trace_start"() <{level = 10 : i32, message = "bqh,bsh->bqs"}> : () -> ()
    %cst = arith.constant dense<0.000000e+00> : vector<2x1x8xf32>
    %45 = tpu.matmul %44, %3, %cst {dimension_numbers = #tpu.dot_dimension_numbers<[2], [2], [1], [1], [0, 0, 0, 1, 1, 1], [0], [0]>} : vector<2x1x32xf32>, vector<2x8x32xf32>, vector<2x1x8xf32> -> vector<2x1x8xf32>
    "tpu.trace_stop"() : () -> ()
    %cst_60 = arith.constant dense<0xFF800000> : vector<2x1xf32>
    %46 = vector.multi_reduction <maximumf>, %45, %cst_60 [2] : vector<2x1x8xf32> to vector<2x1xf32>
    %47 = vector.shape_cast %46 : vector<2x1xf32> to vector<2x1x1xf32>
    %48 = vector.broadcast %47 : vector<2x1x1xf32> to vector<2x1x8xf32>
    %49 = arith.subf %45, %48 : vector<2x1x8xf32>
    %50 = math.exp %49 : vector<2x1x8xf32>
    %cst_61 = arith.constant dense<0.000000e+00> : vector<2x1xf32>
    %51 = vector.multi_reduction <add>, %50, %cst_61 [2] : vector<2x1x8xf32> to vector<2x1xf32>
    %52 = vector.shape_cast %51 : vector<2x1xf32> to vector<2x1x1xf32>
    "tpu.trace_start"() <{level = 10 : i32, message = "bqs,bsf->bqf"}> : () -> ()
    %cst_62 = arith.constant dense<0.000000e+00> : vector<2x1x64xf32>
    %53 = tpu.matmul %50, %4, %cst_62 {dimension_numbers = #tpu.dot_dimension_numbers<[2], [1], [1], [2], [0, 0, 0, 1, 1, 2], [0], [0]>} : vector<2x1x8xf32>, vector<2x8x64xf32>, vector<2x1x64xf32> -> vector<2x1x64xf32>
    "tpu.trace_stop"() : () -> ()
    %54 = vector.broadcast %52 : vector<2x1x1xf32> to vector<2x1x64xf32>
    %55 = arith.divf %53, %54 : vector<2x1x64xf32>
    %56 = vector.shape_cast %55 : vector<2x1x64xf32> to vector<2x64xf32>
    %cst_63 = arith.constant dense<0.000000e+00> : vector<2x32xf32>
    %57 = tpu.matmul %43, %6, %cst_63 {dimension_numbers = #tpu.dot_dimension_numbers<[1], [0], [0], [1], [0, 0, 1, 1], [], []>} : vector<2x16xf32>, vector<16x32xf32>, vector<2x32xf32> -> vector<2x32xf32>
    %cst_64 = arith.constant dense<0.000000e+00> : vector<2x32xf32>
    %58 = tpu.matmul %56, %12, %cst_64 {dimension_numbers = #tpu.dot_dimension_numbers<[1], [0], [0], [1], [0, 0, 1, 1], [], []>} : vector<2x64xf32>, vector<64x32xf32>, vector<2x32xf32> -> vector<2x32xf32>
    %59 = arith.addf %57, %58 : vector<2x32xf32>
    %cst_65 = arith.constant dense<0.000000e+00> : vector<2x32xf32>
    %60 = tpu.matmul %40, %18, %cst_65 {dimension_numbers = #tpu.dot_dimension_numbers<[1], [0], [0], [1], [0, 0, 1, 1], [], []>} : vector<2x32xf32>, vector<32x32xf32>, vector<2x32xf32> -> vector<2x32xf32>
    %61 = arith.addf %59, %60 : vector<2x32xf32>
    %62 = vector.broadcast %27 : vector<1x32xf32> to vector<2x32xf32>
    %63 = arith.addf %61, %62 : vector<2x32xf32>
    %64 = arith.negf %63 : vector<2x32xf32>
    %65 = math.exp %64 : vector<2x32xf32>
    %cst_66 = arith.constant 1.000000e+00 : f32
    %66 = vector.broadcast %cst_66 : f32 to vector<2x32xf32>
    %67 = arith.addf %66, %65 : vector<2x32xf32>
    %68 = arith.divf %66, %67 : vector<2x32xf32>
    %cst_67 = arith.constant dense<0.000000e+00> : vector<2x32xf32>
    %69 = tpu.matmul %43, %8, %cst_67 {dimension_numbers = #tpu.dot_dimension_numbers<[1], [0], [0], [1], [0, 0, 1, 1], [], []>} : vector<2x16xf32>, vector<16x32xf32>, vector<2x32xf32> -> vector<2x32xf32>
    %cst_68 = arith.constant dense<0.000000e+00> : vector<2x32xf32>
    %70 = tpu.matmul %56, %14, %cst_68 {dimension_numbers = #tpu.dot_dimension_numbers<[1], [0], [0], [1], [0, 0, 1, 1], [], []>} : vector<2x64xf32>, vector<64x32xf32>, vector<2x32xf32> -> vector<2x32xf32>
    %71 = arith.addf %69, %70 : vector<2x32xf32>
    %cst_69 = arith.constant dense<0.000000e+00> : vector<2x32xf32>
    %72 = tpu.matmul %40, %20, %cst_69 {dimension_numbers = #tpu.dot_dimension_numbers<[1], [0], [0], [1], [0, 0, 1, 1], [], []>} : vector<2x32xf32>, vector<32x32xf32>, vector<2x32xf32> -> vector<2x32xf32>
    %73 = arith.addf %71, %72 : vector<2x32xf32>
    %74 = vector.broadcast %32 : vector<1x32xf32> to vector<2x32xf32>
    %75 = arith.addf %73, %74 : vector<2x32xf32>
    %76 = arith.negf %75 : vector<2x32xf32>
    %77 = math.exp %76 : vector<2x32xf32>
    %cst_70 = arith.constant 1.000000e+00 : f32
    %78 = vector.broadcast %cst_70 : f32 to vector<2x32xf32>
    %79 = arith.addf %78, %77 : vector<2x32xf32>
    %80 = arith.divf %78, %79 : vector<2x32xf32>
    %cst_71 = arith.constant dense<0.000000e+00> : vector<2x32xf32>
    %81 = tpu.matmul %43, %10, %cst_71 {dimension_numbers = #tpu.dot_dimension_numbers<[1], [0], [0], [1], [0, 0, 1, 1], [], []>} : vector<2x16xf32>, vector<16x32xf32>, vector<2x32xf32> -> vector<2x32xf32>
    %cst_72 = arith.constant dense<0.000000e+00> : vector<2x32xf32>
    %82 = tpu.matmul %56, %16, %cst_72 {dimension_numbers = #tpu.dot_dimension_numbers<[1], [0], [0], [1], [0, 0, 1, 1], [], []>} : vector<2x64xf32>, vector<64x32xf32>, vector<2x32xf32> -> vector<2x32xf32>
    %83 = arith.addf %81, %82 : vector<2x32xf32>
    %84 = vector.broadcast %34 : vector<1x32xf32> to vector<2x32xf32>
    %85 = arith.addf %83, %84 : vector<2x32xf32>
    %cst_73 = arith.constant dense<0.000000e+00> : vector<2x32xf32>
    %86 = tpu.matmul %40, %22, %cst_73 {dimension_numbers = #tpu.dot_dimension_numbers<[1], [0], [0], [1], [0, 0, 1, 1], [], []>} : vector<2x32xf32>, vector<32x32xf32>, vector<2x32xf32> -> vector<2x32xf32>
    %87 = vector.broadcast %36 : vector<1x32xf32> to vector<2x32xf32>
    %88 = arith.addf %86, %87 : vector<2x32xf32>
    %89 = arith.mulf %68, %88 : vector<2x32xf32>
    %90 = arith.addf %85, %89 : vector<2x32xf32>
    %91 = math.tanh %90 : vector<2x32xf32>
    %cst_74 = arith.constant 1.000000e+00 : f32
    %92 = vector.broadcast %cst_74 : f32 to vector<2x32xf32>
    %93 = arith.subf %92, %80 : vector<2x32xf32>
    %94 = arith.mulf %93, %91 : vector<2x32xf32>
    %95 = arith.mulf %80, %40 : vector<2x32xf32>
    %96 = arith.addf %94, %95 : vector<2x32xf32>
    %cst_75 = arith.constant dense<0.000000e+00> : vector<2x32xf32>
    %97 = tpu.matmul %43, %37, %cst_75 {dimension_numbers = #tpu.dot_dimension_numbers<[1], [0], [0], [1], [0, 0, 1, 1], [], []>} : vector<2x16xf32>, vector<16x32xf32>, vector<2x32xf32> -> vector<2x32xf32>
    %cst_76 = arith.constant dense<0.000000e+00> : vector<2x32xf32>
    %98 = tpu.matmul %96, %38, %cst_76 {dimension_numbers = #tpu.dot_dimension_numbers<[1], [0], [0], [1], [0, 0, 1, 1], [], []>} : vector<2x32xf32>, vector<32x32xf32>, vector<2x32xf32> -> vector<2x32xf32>
    %99 = arith.addf %97, %98 : vector<2x32xf32>
    %cst_77 = arith.constant dense<0.000000e+00> : vector<2x32xf32>
    %100 = tpu.matmul %56, %39, %cst_77 {dimension_numbers = #tpu.dot_dimension_numbers<[1], [0], [0], [1], [0, 0, 1, 1], [], []>} : vector<2x64xf32>, vector<64x32xf32>, vector<2x32xf32> -> vector<2x32xf32>
    %101 = arith.addf %99, %100 : vector<2x32xf32>
    %102 = arith.index_cast %c0_i32_57 : i32 to index
    %c0_78 = arith.constant 0 : index
    %c0_79 = arith.constant 0 : index
    %103 = vector.load %arg13[%102, %c0_78, %c0_79] : memref<4x2x32xf32, #tpu.memory_space<vmem>>, vector<1x2x32xf32>
    %104 = vector.shape_cast %103 : vector<1x2x32xf32> to vector<2x32xf32>
    %105 = vector.shape_cast %101 : vector<2x32xf32> to vector<1x2x32xf32>
    tpu.vector_store %arg13[%102, %c0_78, %c0_79], %105 {strides = array<i32>} : memref<4x2x32xf32, #tpu.memory_space<vmem>>, vector<1x2x32xf32>,
    %c4_i32 = arith.constant 4 : i32
    %106 = arith.muli %arg0, %c4_i32 : i32
    %107 = arith.addi %106, %c0_i32_57 : i32
    %c6_i32 = arith.constant 6 : i32
    %108 = arith.cmpi slt, %107, %c6_i32 : i32
    %109 = arith.select %108, %96, %40 : vector<2x32xf32>
    %c1_i32 = arith.constant 1 : i32
    %110 = arith.index_cast %c1_i32 : i32 to index
    %c0_80 = arith.constant 0 : index
    %c0_81 = arith.constant 0 : index
    %111 = vector.load %arg1[%110, %c0_80, %c0_81] : memref<4x2x16xf32, #tpu.memory_space<vmem>>, vector<1x2x16xf32>
    %112 = vector.shape_cast %111 : vector<1x2x16xf32> to vector<2x16xf32>
    %113 = vector.shape_cast %109 : vector<2x32xf32> to vector<2x1x32xf32>
    "tpu.trace_start"() <{level = 10 : i32, message = "bqh,bsh->bqs"}> : () -> ()
    %cst_82 = arith.constant dense<0.000000e+00> : vector<2x1x8xf32>
    %114 = tpu.matmul %113, %3, %cst_82 {dimension_numbers = #tpu.dot_dimension_numbers<[2], [2], [1], [1], [0, 0, 0, 1, 1, 1], [0], [0]>} : vector<2x1x32xf32>, vector<2x8x32xf32>, vector<2x1x8xf32> -> vector<2x1x8xf32>
    "tpu.trace_stop"() : () -> ()
    %cst_83 = arith.constant dense<0xFF800000> : vector<2x1xf32>
    %115 = vector.multi_reduction <maximumf>, %114, %cst_83 [2] : vector<2x1x8xf32> to vector<2x1xf32>
    %116 = vector.shape_cast %115 : vector<2x1xf32> to vector<2x1x1xf32>
    %117 = vector.broadcast %116 : vector<2x1x1xf32> to vector<2x1x8xf32>
    %118 = arith.subf %114, %117 : vector<2x1x8xf32>
    %119 = math.exp %118 : vector<2x1x8xf32>
    %cst_84 = arith.constant dense<0.000000e+00> : vector<2x1xf32>
    %120 = vector.multi_reduction <add>, %119, %cst_84 [2] : vector<2x1x8xf32> to vector<2x1xf32>
    %121 = vector.shape_cast %120 : vector<2x1xf32> to vector<2x1x1xf32>
    "tpu.trace_start"() <{level = 10 : i32, message = "bqs,bsf->bqf"}> : () -> ()
    %cst_85 = arith.constant dense<0.000000e+00> : vector<2x1x64xf32>
    %122 = tpu.matmul %119, %4, %cst_85 {dimension_numbers = #tpu.dot_dimension_numbers<[2], [1], [1], [2], [0, 0, 0, 1, 1, 2], [0], [0]>} : vector<2x1x8xf32>, vector<2x8x64xf32>, vector<2x1x64xf32> -> vector<2x1x64xf32>
    "tpu.trace_stop"() : () -> ()
    %123 = vector.broadcast %121 : vector<2x1x1xf32> to vector<2x1x64xf32>
    %124 = arith.divf %122, %123 : vector<2x1x64xf32>
    %125 = vector.shape_cast %124 : vector<2x1x64xf32> to vector<2x64xf32>
    %cst_86 = arith.constant dense<0.000000e+00> : vector<2x32xf32>
    %126 = tpu.matmul %112, %6, %cst_86 {dimension_numbers = #tpu.dot_dimension_numbers<[1], [0], [0], [1], [0, 0, 1, 1], [], []>} : vector<2x16xf32>, vector<16x32xf32>, vector<2x32xf32> -> vector<2x32xf32>
    %cst_87 = arith.constant dense<0.000000e+00> : vector<2x32xf32>
    %127 = tpu.matmul %125, %12, %cst_87 {dimension_numbers = #tpu.dot_dimension_numbers<[1], [0], [0], [1], [0, 0, 1, 1], [], []>} : vector<2x64xf32>, vector<64x32xf32>, vector<2x32xf32> -> vector<2x32xf32>
    %128 = arith.addf %126, %127 : vector<2x32xf32>
    %cst_88 = arith.constant dense<0.000000e+00> : vector<2x32xf32>
    %129 = tpu.matmul %109, %18, %cst_88 {dimension_numbers = #tpu.dot_dimension_numbers<[1], [0], [0], [1], [0, 0, 1, 1], [], []>} : vector<2x32xf32>, vector<32x32xf32>, vector<2x32xf32> -> vector<2x32xf32>
    %130 = arith.addf %128, %129 : vector<2x32xf32>
    %131 = vector.broadcast %27 : vector<1x32xf32> to vector<2x32xf32>
    %132 = arith.addf %130, %131 : vector<2x32xf32>
    %133 = arith.negf %132 : vector<2x32xf32>
    %134 = math.exp %133 : vector<2x32xf32>
    %cst_89 = arith.constant 1.000000e+00 : f32
    %135 = vector.broadcast %cst_89 : f32 to vector<2x32xf32>
    %136 = arith.addf %135, %134 : vector<2x32xf32>
    %137 = arith.divf %135, %136 : vector<2x32xf32>
    %cst_90 = arith.constant dense<0.000000e+00> : vector<2x32xf32>
    %138 = tpu.matmul %112, %8, %cst_90 {dimension_numbers = #tpu.dot_dimension_numbers<[1], [0], [0], [1], [0, 0, 1, 1], [], []>} : vector<2x16xf32>, vector<16x32xf32>, vector<2x32xf32> -> vector<2x32xf32>
    %cst_91 = arith.constant dense<0.000000e+00> : vector<2x32xf32>
    %139 = tpu.matmul %125, %14, %cst_91 {dimension_numbers = #tpu.dot_dimension_numbers<[1], [0], [0], [1], [0, 0, 1, 1], [], []>} : vector<2x64xf32>, vector<64x32xf32>, vector<2x32xf32> -> vector<2x32xf32>
    %140 = arith.addf %138, %139 : vector<2x32xf32>
    %cst_92 = arith.constant dense<0.000000e+00> : vector<2x32xf32>
    %141 = tpu.matmul %109, %20, %cst_92 {dimension_numbers = #tpu.dot_dimension_numbers<[1], [0], [0], [1], [0, 0, 1, 1], [], []>} : vector<2x32xf32>, vector<32x32xf32>, vector<2x32xf32> -> vector<2x32xf32>
    %142 = arith.addf %140, %141 : vector<2x32xf32>
    %143 = vector.broadcast %32 : vector<1x32xf32> to vector<2x32xf32>
    %144 = arith.addf %142, %143 : vector<2x32xf32>
    %145 = arith.negf %144 : vector<2x32xf32>
    %146 = math.exp %145 : vector<2x32xf32>
    %cst_93 = arith.constant 1.000000e+00 : f32
    %147 = vector.broadcast %cst_93 : f32 to vector<2x32xf32>
    %148 = arith.addf %147, %146 : vector<2x32xf32>
    %149 = arith.divf %147, %148 : vector<2x32xf32>
    %cst_94 = arith.constant dense<0.000000e+00> : vector<2x32xf32>
    %150 = tpu.matmul %112, %10, %cst_94 {dimension_numbers = #tpu.dot_dimension_numbers<[1], [0], [0], [1], [0, 0, 1, 1], [], []>} : vector<2x16xf32>, vector<16x32xf32>, vector<2x32xf32> -> vector<2x32xf32>
    %cst_95 = arith.constant dense<0.000000e+00> : vector<2x32xf32>
    %151 = tpu.matmul %125, %16, %cst_95 {dimension_numbers = #tpu.dot_dimension_numbers<[1], [0], [0], [1], [0, 0, 1, 1], [], []>} : vector<2x64xf32>, vector<64x32xf32>, vector<2x32xf32> -> vector<2x32xf32>
    %152 = arith.addf %150, %151 : vector<2x32xf32>
    %153 = vector.broadcast %34 : vector<1x32xf32> to vector<2x32xf32>
    %154 = arith.addf %152, %153 : vector<2x32xf32>
    %cst_96 = arith.constant dense<0.000000e+00> : vector<2x32xf32>
    %155 = tpu.matmul %109, %22, %cst_96 {dimension_numbers = #tpu.dot_dimension_numbers<[1], [0], [0], [1], [0, 0, 1, 1], [], []>} : vector<2x32xf32>, vector<32x32xf32>, vector<2x32xf32> -> vector<2x32xf32>
    %156 = vector.broadcast %36 : vector<1x32xf32> to vector<2x32xf32>
    %157 = arith.addf %155, %156 : vector<2x32xf32>
    %158 = arith.mulf %137, %157 : vector<2x32xf32>
    %159 = arith.addf %154, %158 : vector<2x32xf32>
    %160 = math.tanh %159 : vector<2x32xf32>
    %cst_97 = arith.constant 1.000000e+00 : f32
    %161 = vector.broadcast %cst_97 : f32 to vector<2x32xf32>
    %162 = arith.subf %161, %149 : vector<2x32xf32>
    %163 = arith.mulf %162, %160 : vector<2x32xf32>
    %164 = arith.mulf %149, %109 : vector<2x32xf32>
    %165 = arith.addf %163, %164 : vector<2x32xf32>
    %cst_98 = arith.constant dense<0.000000e+00> : vector<2x32xf32>
    %166 = tpu.matmul %112, %37, %cst_98 {dimension_numbers = #tpu.dot_dimension_numbers<[1], [0], [0], [1], [0, 0, 1, 1], [], []>} : vector<2x16xf32>, vector<16x32xf32>, vector<2x32xf32> -> vector<2x32xf32>
    %cst_99 = arith.constant dense<0.000000e+00> : vector<2x32xf32>
    %167 = tpu.matmul %165, %38, %cst_99 {dimension_numbers = #tpu.dot_dimension_numbers<[1], [0], [0], [1], [0, 0, 1, 1], [], []>} : vector<2x32xf32>, vector<32x32xf32>, vector<2x32xf32> -> vector<2x32xf32>
    %168 = arith.addf %166, %167 : vector<2x32xf32>
    %cst_100 = arith.constant dense<0.000000e+00> : vector<2x32xf32>
    %169 = tpu.matmul %125, %39, %cst_100 {dimension_numbers = #tpu.dot_dimension_numbers<[1], [0], [0], [1], [0, 0, 1, 1], [], []>} : vector<2x64xf32>, vector<64x32xf32>, vector<2x32xf32> -> vector<2x32xf32>
    %170 = arith.addf %168, %169 : vector<2x32xf32>
    %171 = arith.index_cast %c1_i32 : i32 to index
    %c0_101 = arith.constant 0 : index
    %c0_102 = arith.constant 0 : index
    %172 = vector.load %arg13[%171, %c0_101, %c0_102] : memref<4x2x32xf32, #tpu.memory_space<vmem>>, vector<1x2x32xf32>
    %173 = vector.shape_cast %172 : vector<1x2x32xf32> to vector<2x32xf32>
    %174 = vector.shape_cast %170 : vector<2x32xf32> to vector<1x2x32xf32>
    tpu.vector_store %arg13[%171, %c0_101, %c0_102], %174 {strides = array<i32>} : memref<4x2x32xf32, #tpu.memory_space<vmem>>, vector<1x2x32xf32>,
    %c4_i32_103 = arith.constant 4 : i32
    %175 = arith.muli %arg0, %c4_i32_103 : i32
    %176 = arith.addi %175, %c1_i32 : i32
    %c6_i32_104 = arith.constant 6 : i32
    %177 = arith.cmpi slt, %176, %c6_i32_104 : i32
    %178 = arith.select %177, %165, %109 : vector<2x32xf32>
    %c2_i32 = arith.constant 2 : i32
    %179 = arith.index_cast %c2_i32 : i32 to index
    %c0_105 = arith.constant 0 : index
    %c0_106 = arith.constant 0 : index
    %180 = vector.load %arg1[%179, %c0_105, %c0_106] : memref<4x2x16xf32, #tpu.memory_space<vmem>>, vector<1x2x16xf32>
    %181 = vector.shape_cast %180 : vector<1x2x16xf32> to vector<2x16xf32>
    %182 = vector.shape_cast %178 : vector<2x32xf32> to vector<2x1x32xf32>
    "tpu.trace_start"() <{level = 10 : i32, message = "bqh,bsh->bqs"}> : () -> ()
    %cst_107 = arith.constant dense<0.000000e+00> : vector<2x1x8xf32>
    %183 = tpu.matmul %182, %3, %cst_107 {dimension_numbers = #tpu.dot_dimension_numbers<[2], [2], [1], [1], [0, 0, 0, 1, 1, 1], [0], [0]>} : vector<2x1x32xf32>, vector<2x8x32xf32>, vector<2x1x8xf32> -> vector<2x1x8xf32>
    "tpu.trace_stop"() : () -> ()
    %cst_108 = arith.constant dense<0xFF800000> : vector<2x1xf32>
    %184 = vector.multi_reduction <maximumf>, %183, %cst_108 [2] : vector<2x1x8xf32> to vector<2x1xf32>
    %185 = vector.shape_cast %184 : vector<2x1xf32> to vector<2x1x1xf32>
    %186 = vector.broadcast %185 : vector<2x1x1xf32> to vector<2x1x8xf32>
    %187 = arith.subf %183, %186 : vector<2x1x8xf32>
    %188 = math.exp %187 : vector<2x1x8xf32>
    %cst_109 = arith.constant dense<0.000000e+00> : vector<2x1xf32>
    %189 = vector.multi_reduction <add>, %188, %cst_109 [2] : vector<2x1x8xf32> to vector<2x1xf32>
    %190 = vector.shape_cast %189 : vector<2x1xf32> to vector<2x1x1xf32>
    "tpu.trace_start"() <{level = 10 : i32, message = "bqs,bsf->bqf"}> : () -> ()
    %cst_110 = arith.constant dense<0.000000e+00> : vector<2x1x64xf32>
    %191 = tpu.matmul %188, %4, %cst_110 {dimension_numbers = #tpu.dot_dimension_numbers<[2], [1], [1], [2], [0, 0, 0, 1, 1, 2], [0], [0]>} : vector<2x1x8xf32>, vector<2x8x64xf32>, vector<2x1x64xf32> -> vector<2x1x64xf32>
    "tpu.trace_stop"() : () -> ()
    %192 = vector.broadcast %190 : vector<2x1x1xf32> to vector<2x1x64xf32>
    %193 = arith.divf %191, %192 : vector<2x1x64xf32>
    %194 = vector.shape_cast %193 : vector<2x1x64xf32> to vector<2x64xf32>
    %cst_111 = arith.constant dense<0.000000e+00> : vector<2x32xf32>
    %195 = tpu.matmul %181, %6, %cst_111 {dimension_numbers = #tpu.dot_dimension_numbers<[1], [0], [0], [1], [0, 0, 1, 1], [], []>} : vector<2x16xf32>, vector<16x32xf32>, vector<2x32xf32> -> vector<2x32xf32>
    %cst_112 = arith.constant dense<0.000000e+00> : vector<2x32xf32>
    %196 = tpu.matmul %194, %12, %cst_112 {dimension_numbers = #tpu.dot_dimension_numbers<[1], [0], [0], [1], [0, 0, 1, 1], [], []>} : vector<2x64xf32>, vector<64x32xf32>, vector<2x32xf32> -> vector<2x32xf32>
    %197 = arith.addf %195, %196 : vector<2x32xf32>
    %cst_113 = arith.constant dense<0.000000e+00> : vector<2x32xf32>
    %198 = tpu.matmul %178, %18, %cst_113 {dimension_numbers = #tpu.dot_dimension_numbers<[1], [0], [0], [1], [0, 0, 1, 1], [], []>} : vector<2x32xf32>, vector<32x32xf32>, vector<2x32xf32> -> vector<2x32xf32>
    %199 = arith.addf %197, %198 : vector<2x32xf32>
    %200 = vector.broadcast %27 : vector<1x32xf32> to vector<2x32xf32>
    %201 = arith.addf %199, %200 : vector<2x32xf32>
    %202 = arith.negf %201 : vector<2x32xf32>
    %203 = math.exp %202 : vector<2x32xf32>
    %cst_114 = arith.constant 1.000000e+00 : f32
    %204 = vector.broadcast %cst_114 : f32 to vector<2x32xf32>
    %205 = arith.addf %204, %203 : vector<2x32xf32>
    %206 = arith.divf %204, %205 : vector<2x32xf32>
    %cst_115 = arith.constant dense<0.000000e+00> : vector<2x32xf32>
    %207 = tpu.matmul %181, %8, %cst_115 {dimension_numbers = #tpu.dot_dimension_numbers<[1], [0], [0], [1], [0, 0, 1, 1], [], []>} : vector<2x16xf32>, vector<16x32xf32>, vector<2x32xf32> -> vector<2x32xf32>
    %cst_116 = arith.constant dense<0.000000e+00> : vector<2x32xf32>
    %208 = tpu.matmul %194, %14, %cst_116 {dimension_numbers = #tpu.dot_dimension_numbers<[1], [0], [0], [1], [0, 0, 1, 1], [], []>} : vector<2x64xf32>, vector<64x32xf32>, vector<2x32xf32> -> vector<2x32xf32>
    %209 = arith.addf %207, %208 : vector<2x32xf32>
    %cst_117 = arith.constant dense<0.000000e+00> : vector<2x32xf32>
    %210 = tpu.matmul %178, %20, %cst_117 {dimension_numbers = #tpu.dot_dimension_numbers<[1], [0], [0], [1], [0, 0, 1, 1], [], []>} : vector<2x32xf32>, vector<32x32xf32>, vector<2x32xf32> -> vector<2x32xf32>
    %211 = arith.addf %209, %210 : vector<2x32xf32>
    %212 = vector.broadcast %32 : vector<1x32xf32> to vector<2x32xf32>
    %213 = arith.addf %211, %212 : vector<2x32xf32>
    %214 = arith.negf %213 : vector<2x32xf32>
    %215 = math.exp %214 : vector<2x32xf32>
    %cst_118 = arith.constant 1.000000e+00 : f32
    %216 = vector.broadcast %cst_118 : f32 to vector<2x32xf32>
    %217 = arith.addf %216, %215 : vector<2x32xf32>
    %218 = arith.divf %216, %217 : vector<2x32xf32>
    %cst_119 = arith.constant dense<0.000000e+00> : vector<2x32xf32>
    %219 = tpu.matmul %181, %10, %cst_119 {dimension_numbers = #tpu.dot_dimension_numbers<[1], [0], [0], [1], [0, 0, 1, 1], [], []>} : vector<2x16xf32>, vector<16x32xf32>, vector<2x32xf32> -> vector<2x32xf32>
    %cst_120 = arith.constant dense<0.000000e+00> : vector<2x32xf32>
    %220 = tpu.matmul %194, %16, %cst_120 {dimension_numbers = #tpu.dot_dimension_numbers<[1], [0], [0], [1], [0, 0, 1, 1], [], []>} : vector<2x64xf32>, vector<64x32xf32>, vector<2x32xf32> -> vector<2x32xf32>
    %221 = arith.addf %219, %220 : vector<2x32xf32>
    %222 = vector.broadcast %34 : vector<1x32xf32> to vector<2x32xf32>
    %223 = arith.addf %221, %222 : vector<2x32xf32>
    %cst_121 = arith.constant dense<0.000000e+00> : vector<2x32xf32>
    %224 = tpu.matmul %178, %22, %cst_121 {dimension_numbers = #tpu.dot_dimension_numbers<[1], [0], [0], [1], [0, 0, 1, 1], [], []>} : vector<2x32xf32>, vector<32x32xf32>, vector<2x32xf32> -> vector<2x32xf32>
    %225 = vector.broadcast %36 : vector<1x32xf32> to vector<2x32xf32>
    %226 = arith.addf %224, %225 : vector<2x32xf32>
    %227 = arith.mulf %206, %226 : vector<2x32xf32>
    %228 = arith.addf %223, %227 : vector<2x32xf32>
    %229 = math.tanh %228 : vector<2x32xf32>
    %cst_122 = arith.constant 1.000000e+00 : f32
    %230 = vector.broadcast %cst_122 : f32 to vector<2x32xf32>
    %231 = arith.subf %230, %218 : vector<2x32xf32>
    %232 = arith.mulf %231, %229 : vector<2x32xf32>
    %233 = arith.mulf %218, %178 : vector<2x32xf32>
    %234 = arith.addf %232, %233 : vector<2x32xf32>
    %cst_123 = arith.constant dense<0.000000e+00> : vector<2x32xf32>
    %235 = tpu.matmul %181, %37, %cst_123 {dimension_numbers = #tpu.dot_dimension_numbers<[1], [0], [0], [1], [0, 0, 1, 1], [], []>} : vector<2x16xf32>, vector<16x32xf32>, vector<2x32xf32> -> vector<2x32xf32>
    %cst_124 = arith.constant dense<0.000000e+00> : vector<2x32xf32>
    %236 = tpu.matmul %234, %38, %cst_124 {dimension_numbers = #tpu.dot_dimension_numbers<[1], [0], [0], [1], [0, 0, 1, 1], [], []>} : vector<2x32xf32>, vector<32x32xf32>, vector<2x32xf32> -> vector<2x32xf32>
    %237 = arith.addf %235, %236 : vector<2x32xf32>
    %cst_125 = arith.constant dense<0.000000e+00> : vector<2x32xf32>
    %238 = tpu.matmul %194, %39, %cst_125 {dimension_numbers = #tpu.dot_dimension_numbers<[1], [0], [0], [1], [0, 0, 1, 1], [], []>} : vector<2x64xf32>, vector<64x32xf32>, vector<2x32xf32> -> vector<2x32xf32>
    %239 = arith.addf %237, %238 : vector<2x32xf32>
    %240 = arith.index_cast %c2_i32 : i32 to index
    %c0_126 = arith.constant 0 : index
    %c0_127 = arith.constant 0 : index
    %241 = vector.load %arg13[%240, %c0_126, %c0_127] : memref<4x2x32xf32, #tpu.memory_space<vmem>>, vector<1x2x32xf32>
    %242 = vector.shape_cast %241 : vector<1x2x32xf32> to vector<2x32xf32>
    %243 = vector.shape_cast %239 : vector<2x32xf32> to vector<1x2x32xf32>
    tpu.vector_store %arg13[%240, %c0_126, %c0_127], %243 {strides = array<i32>} : memref<4x2x32xf32, #tpu.memory_space<vmem>>, vector<1x2x32xf32>,
    %c4_i32_128 = arith.constant 4 : i32
    %244 = arith.muli %arg0, %c4_i32_128 : i32
    %245 = arith.addi %244, %c2_i32 : i32
    %c6_i32_129 = arith.constant 6 : i32
    %246 = arith.cmpi slt, %245, %c6_i32_129 : i32
    %247 = arith.select %246, %234, %178 : vector<2x32xf32>
    %c3_i32 = arith.constant 3 : i32
    %248 = arith.index_cast %c3_i32 : i32 to index
    %c0_130 = arith.constant 0 : index
    %c0_131 = arith.constant 0 : index
    %249 = vector.load %arg1[%248, %c0_130, %c0_131] : memref<4x2x16xf32, #tpu.memory_space<vmem>>, vector<1x2x16xf32>
    %250 = vector.shape_cast %249 : vector<1x2x16xf32> to vector<2x16xf32>
    %251 = vector.shape_cast %247 : vector<2x32xf32> to vector<2x1x32xf32>
    "tpu.trace_start"() <{level = 10 : i32, message = "bqh,bsh->bqs"}> : () -> ()
    %cst_132 = arith.constant dense<0.000000e+00> : vector<2x1x8xf32>
    %252 = tpu.matmul %251, %3, %cst_132 {dimension_numbers = #tpu.dot_dimension_numbers<[2], [2], [1], [1], [0, 0, 0, 1, 1, 1], [0], [0]>} : vector<2x1x32xf32>, vector<2x8x32xf32>, vector<2x1x8xf32> -> vector<2x1x8xf32>
    "tpu.trace_stop"() : () -> ()
    %cst_133 = arith.constant dense<0xFF800000> : vector<2x1xf32>
    %253 = vector.multi_reduction <maximumf>, %252, %cst_133 [2] : vector<2x1x8xf32> to vector<2x1xf32>
    %254 = vector.shape_cast %253 : vector<2x1xf32> to vector<2x1x1xf32>
    %255 = vector.broadcast %254 : vector<2x1x1xf32> to vector<2x1x8xf32>
    %256 = arith.subf %252, %255 : vector<2x1x8xf32>
    %257 = math.exp %256 : vector<2x1x8xf32>
    %cst_134 = arith.constant dense<0.000000e+00> : vector<2x1xf32>
    %258 = vector.multi_reduction <add>, %257, %cst_134 [2] : vector<2x1x8xf32> to vector<2x1xf32>
    %259 = vector.shape_cast %258 : vector<2x1xf32> to vector<2x1x1xf32>
    "tpu.trace_start"() <{level = 10 : i32, message = "bqs,bsf->bqf"}> : () -> ()
    %cst_135 = arith.constant dense<0.000000e+00> : vector<2x1x64xf32>
    %260 = tpu.matmul %257, %4, %cst_135 {dimension_numbers = #tpu.dot_dimension_numbers<[2], [1], [1], [2], [0, 0, 0, 1, 1, 2], [0], [0]>} : vector<2x1x8xf32>, vector<2x8x64xf32>, vector<2x1x64xf32> -> vector<2x1x64xf32>
    "tpu.trace_stop"() : () -> ()
    %261 = vector.broadcast %259 : vector<2x1x1xf32> to vector<2x1x64xf32>
    %262 = arith.divf %260, %261 : vector<2x1x64xf32>
    %263 = vector.shape_cast %262 : vector<2x1x64xf32> to vector<2x64xf32>
    %cst_136 = arith.constant dense<0.000000e+00> : vector<2x32xf32>
    %264 = tpu.matmul %250, %6, %cst_136 {dimension_numbers = #tpu.dot_dimension_numbers<[1], [0], [0], [1], [0, 0, 1, 1], [], []>} : vector<2x16xf32>, vector<16x32xf32>, vector<2x32xf32> -> vector<2x32xf32>
    %cst_137 = arith.constant dense<0.000000e+00> : vector<2x32xf32>
    %265 = tpu.matmul %263, %12, %cst_137 {dimension_numbers = #tpu.dot_dimension_numbers<[1], [0], [0], [1], [0, 0, 1, 1], [], []>} : vector<2x64xf32>, vector<64x32xf32>, vector<2x32xf32> -> vector<2x32xf32>
    %266 = arith.addf %264, %265 : vector<2x32xf32>
    %cst_138 = arith.constant dense<0.000000e+00> : vector<2x32xf32>
    %267 = tpu.matmul %247, %18, %cst_138 {dimension_numbers = #tpu.dot_dimension_numbers<[1], [0], [0], [1], [0, 0, 1, 1], [], []>} : vector<2x32xf32>, vector<32x32xf32>, vector<2x32xf32> -> vector<2x32xf32>
    %268 = arith.addf %266, %267 : vector<2x32xf32>
    %269 = vector.broadcast %27 : vector<1x32xf32> to vector<2x32xf32>
    %270 = arith.addf %268, %269 : vector<2x32xf32>
    %271 = arith.negf %270 : vector<2x32xf32>
    %272 = math.exp %271 : vector<2x32xf32>
    %cst_139 = arith.constant 1.000000e+00 : f32
    %273 = vector.broadcast %cst_139 : f32 to vector<2x32xf32>
    %274 = arith.addf %273, %272 : vector<2x32xf32>
    %275 = arith.divf %273, %274 : vector<2x32xf32>
    %cst_140 = arith.constant dense<0.000000e+00> : vector<2x32xf32>
    %276 = tpu.matmul %250, %8, %cst_140 {dimension_numbers = #tpu.dot_dimension_numbers<[1], [0], [0], [1], [0, 0, 1, 1], [], []>} : vector<2x16xf32>, vector<16x32xf32>, vector<2x32xf32> -> vector<2x32xf32>
    %cst_141 = arith.constant dense<0.000000e+00> : vector<2x32xf32>
    %277 = tpu.matmul %263, %14, %cst_141 {dimension_numbers = #tpu.dot_dimension_numbers<[1], [0], [0], [1], [0, 0, 1, 1], [], []>} : vector<2x64xf32>, vector<64x32xf32>, vector<2x32xf32> -> vector<2x32xf32>
    %278 = arith.addf %276, %277 : vector<2x32xf32>
    %cst_142 = arith.constant dense<0.000000e+00> : vector<2x32xf32>
    %279 = tpu.matmul %247, %20, %cst_142 {dimension_numbers = #tpu.dot_dimension_numbers<[1], [0], [0], [1], [0, 0, 1, 1], [], []>} : vector<2x32xf32>, vector<32x32xf32>, vector<2x32xf32> -> vector<2x32xf32>
    %280 = arith.addf %278, %279 : vector<2x32xf32>
    %281 = vector.broadcast %32 : vector<1x32xf32> to vector<2x32xf32>
    %282 = arith.addf %280, %281 : vector<2x32xf32>
    %283 = arith.negf %282 : vector<2x32xf32>
    %284 = math.exp %283 : vector<2x32xf32>
    %cst_143 = arith.constant 1.000000e+00 : f32
    %285 = vector.broadcast %cst_143 : f32 to vector<2x32xf32>
    %286 = arith.addf %285, %284 : vector<2x32xf32>
    %287 = arith.divf %285, %286 : vector<2x32xf32>
    %cst_144 = arith.constant dense<0.000000e+00> : vector<2x32xf32>
    %288 = tpu.matmul %250, %10, %cst_144 {dimension_numbers = #tpu.dot_dimension_numbers<[1], [0], [0], [1], [0, 0, 1, 1], [], []>} : vector<2x16xf32>, vector<16x32xf32>, vector<2x32xf32> -> vector<2x32xf32>
    %cst_145 = arith.constant dense<0.000000e+00> : vector<2x32xf32>
    %289 = tpu.matmul %263, %16, %cst_145 {dimension_numbers = #tpu.dot_dimension_numbers<[1], [0], [0], [1], [0, 0, 1, 1], [], []>} : vector<2x64xf32>, vector<64x32xf32>, vector<2x32xf32> -> vector<2x32xf32>
    %290 = arith.addf %288, %289 : vector<2x32xf32>
    %291 = vector.broadcast %34 : vector<1x32xf32> to vector<2x32xf32>
    %292 = arith.addf %290, %291 : vector<2x32xf32>
    %cst_146 = arith.constant dense<0.000000e+00> : vector<2x32xf32>
    %293 = tpu.matmul %247, %22, %cst_146 {dimension_numbers = #tpu.dot_dimension_numbers<[1], [0], [0], [1], [0, 0, 1, 1], [], []>} : vector<2x32xf32>, vector<32x32xf32>, vector<2x32xf32> -> vector<2x32xf32>
    %294 = vector.broadcast %36 : vector<1x32xf32> to vector<2x32xf32>
    %295 = arith.addf %293, %294 : vector<2x32xf32>
    %296 = arith.mulf %275, %295 : vector<2x32xf32>
    %297 = arith.addf %292, %296 : vector<2x32xf32>
    %298 = math.tanh %297 : vector<2x32xf32>
    %cst_147 = arith.constant 1.000000e+00 : f32
    %299 = vector.broadcast %cst_147 : f32 to vector<2x32xf32>
    %300 = arith.subf %299, %287 : vector<2x32xf32>
    %301 = arith.mulf %300, %298 : vector<2x32xf32>
    %302 = arith.mulf %287, %247 : vector<2x32xf32>
    %303 = arith.addf %301, %302 : vector<2x32xf32>
    %cst_148 = arith.constant dense<0.000000e+00> : vector<2x32xf32>
    %304 = tpu.matmul %250, %37, %cst_148 {dimension_numbers = #tpu.dot_dimension_numbers<[1], [0], [0], [1], [0, 0, 1, 1], [], []>} : vector<2x16xf32>, vector<16x32xf32>, vector<2x32xf32> -> vector<2x32xf32>
    %cst_149 = arith.constant dense<0.000000e+00> : vector<2x32xf32>
    %305 = tpu.matmul %303, %38, %cst_149 {dimension_numbers = #tpu.dot_dimension_numbers<[1], [0], [0], [1], [0, 0, 1, 1], [], []>} : vector<2x32xf32>, vector<32x32xf32>, vector<2x32xf32> -> vector<2x32xf32>
    %306 = arith.addf %304, %305 : vector<2x32xf32>
    %cst_150 = arith.constant dense<0.000000e+00> : vector<2x32xf32>
    %307 = tpu.matmul %263, %39, %cst_150 {dimension_numbers = #tpu.dot_dimension_numbers<[1], [0], [0], [1], [0, 0, 1, 1], [], []>} : vector<2x64xf32>, vector<64x32xf32>, vector<2x32xf32> -> vector<2x32xf32>
    %308 = arith.addf %306, %307 : vector<2x32xf32>
    %309 = arith.index_cast %c3_i32 : i32 to index
    %c0_151 = arith.constant 0 : index
    %c0_152 = arith.constant 0 : index
    %310 = vector.load %arg13[%309, %c0_151, %c0_152] : memref<4x2x32xf32, #tpu.memory_space<vmem>>, vector<1x2x32xf32>
    %311 = vector.shape_cast %310 : vector<1x2x32xf32> to vector<2x32xf32>
    %312 = vector.shape_cast %308 : vector<2x32xf32> to vector<1x2x32xf32>
    tpu.vector_store %arg13[%309, %c0_151, %c0_152], %312 {strides = array<i32>} : memref<4x2x32xf32, #tpu.memory_space<vmem>>, vector<1x2x32xf32>,
    %c4_i32_153 = arith.constant 4 : i32
    %313 = arith.muli %arg0, %c4_i32_153 : i32
    %314 = arith.addi %313, %c3_i32 : i32
    %c6_i32_154 = arith.constant 6 : i32
    %315 = arith.cmpi slt, %314, %c6_i32_154 : i32
    %316 = arith.select %315, %303, %247 : vector<2x32xf32>
    %c4_i32_155 = arith.constant 4 : i32
    %c0_156 = arith.constant 0 : index
    %c0_157 = arith.constant 0 : index
    %317 = vector.load %arg15[%c0_156, %c0_157] : memref<2x32xf32, #tpu.memory_space<vmem>>, vector<2x32xf32>
    tpu.vector_store %arg15[%c0_156, %c0_157], %316 {strides = array<i32>} : memref<2x32xf32, #tpu.memory_space<vmem>>, vector<2x32xf32>,
    %c1_i32_158 = arith.constant 1 : i32
    %318 = arith.cmpi eq, %arg0, %c1_i32_158 : i32
    %319 = arith.extui %318 : i1 to i32
    %c0_i32_159 = arith.constant 0 : i32
    %320 = arith.cmpi ne, %319, %c0_i32_159 : i32
    scf.if %320 {
      %c0_160 = arith.constant 0 : index
      %c0_161 = arith.constant 0 : index
      %321 = vector.load %arg14[%c0_160, %c0_161] : memref<2x32xf32, #tpu.memory_space<vmem>>, vector<2x32xf32>
      tpu.vector_store %arg14[%c0_160, %c0_161], %316 {strides = array<i32>} : memref<2x32xf32, #tpu.memory_space<vmem>>, vector<2x32xf32>,
    } else {
    }
    return
  }
  func.func @transform_0(%arg0: i32) -> (i32, i32, i32) {
    %c0_i32 = arith.constant 0 : i32
    %c0_i32_0 = arith.constant 0 : i32
    %c0_i32_1 = arith.constant 0 : i32
    return %arg0, %c0_i32, %c0_i32_0 : i32, i32, i32
  }
  func.func @transform_1(%arg0: i32) -> (i32, i32, i32) {
    %c0_i32 = arith.constant 0 : i32
    %c0_i32_0 = arith.constant 0 : i32
    %c0_i32_1 = arith.constant 0 : i32
    %c0_i32_2 = arith.constant 0 : i32
    return %c0_i32, %c0_i32_0, %c0_i32_1 : i32, i32, i32
  }
  func.func @transform_2(%arg0: i32) -> (i32, i32, i32) {
    %c0_i32 = arith.constant 0 : i32
    %c0_i32_0 = arith.constant 0 : i32
    %c0_i32_1 = arith.constant 0 : i32
    %c0_i32_2 = arith.constant 0 : i32
    return %c0_i32, %c0_i32_0, %c0_i32_1 : i32, i32, i32
  }
  func.func @transform_3(%arg0: i32) -> (i32, i32) {
    %c0_i32 = arith.constant 0 : i32
    %c0_i32_0 = arith.constant 0 : i32
    %c0_i32_1 = arith.constant 0 : i32
    return %c0_i32, %c0_i32_0 : i32, i32
  }
  func.func @transform_4(%arg0: i32) -> (i32, i32, i32) {
    %c0_i32 = arith.constant 0 : i32
    %c0_i32_0 = arith.constant 0 : i32
    %c0_i32_1 = arith.constant 0 : i32
    %c0_i32_2 = arith.constant 0 : i32
    return %c0_i32, %c0_i32_0, %c0_i32_1 : i32, i32, i32
  }
  func.func @transform_5(%arg0: i32) -> (i32, i32, i32) {
    %c0_i32 = arith.constant 0 : i32
    %c0_i32_0 = arith.constant 0 : i32
    %c0_i32_1 = arith.constant 0 : i32
    %c0_i32_2 = arith.constant 0 : i32
    return %c0_i32, %c0_i32_0, %c0_i32_1 : i32, i32, i32
  }
  func.func @transform_6(%arg0: i32) -> (i32, i32, i32) {
    %c0_i32 = arith.constant 0 : i32
    %c0_i32_0 = arith.constant 0 : i32
    %c0_i32_1 = arith.constant 0 : i32
    %c0_i32_2 = arith.constant 0 : i32
    return %c0_i32, %c0_i32_0, %c0_i32_1 : i32, i32, i32
  }
  func.func @transform_7(%arg0: i32) -> (i32, i32, i32) {
    %c0_i32 = arith.constant 0 : i32
    %c0_i32_0 = arith.constant 0 : i32
    %c0_i32_1 = arith.constant 0 : i32
    %c0_i32_2 = arith.constant 0 : i32
    return %c0_i32, %c0_i32_0, %c0_i32_1 : i32, i32, i32
  }
  func.func @transform_8(%arg0: i32) -> (i32, i32, i32) {
    %c0_i32 = arith.constant 0 : i32
    %c0_i32_0 = arith.constant 0 : i32
    %c0_i32_1 = arith.constant 0 : i32
    %c0_i32_2 = arith.constant 0 : i32
    return %c0_i32, %c0_i32_0, %c0_i32_1 : i32, i32, i32
  }
  func.func @transform_9(%arg0: i32) -> (i32, i32) {
    %c0_i32 = arith.constant 0 : i32
    %c0_i32_0 = arith.constant 0 : i32
    %c0_i32_1 = arith.constant 0 : i32
    return %c0_i32, %c0_i32_0 : i32, i32
  }
  func.func @transform_10(%arg0: i32) -> (i32, i32) {
    %c0_i32 = arith.constant 0 : i32
    %c0_i32_0 = arith.constant 0 : i32
    %c0_i32_1 = arith.constant 0 : i32
    return %c0_i32, %c0_i32_0 : i32, i32
  }
  func.func @transform_11(%arg0: i32) -> (i32, i32) {
    %c0_i32 = arith.constant 0 : i32
    %c0_i32_0 = arith.constant 0 : i32
    %c0_i32_1 = arith.constant 0 : i32
    return %c0_i32, %c0_i32_0 : i32, i32
  }
  func.func @transform_12(%arg0: i32) -> (i32, i32, i32) {
    %c0_i32 = arith.constant 0 : i32
    %c0_i32_0 = arith.constant 0 : i32
    %c0_i32_1 = arith.constant 0 : i32
    return %arg0, %c0_i32, %c0_i32_0 : i32, i32, i32
  }
  func.func @transform_13(%arg0: i32) -> (i32, i32) {
    %c0_i32 = arith.constant 0 : i32
    %c0_i32_0 = arith.constant 0 : i32
    %c0_i32_1 = arith.constant 0 : i32
    return %c0_i32, %c0_i32_0 : i32, i32
  }
}

</mosaic_0001>

<bundles_post_ra>
// kernel: decoder_forward.1
= control target key start
LH: loop header
LB: loop body
LE: loop exit
PB: predicated region body
PF: predicated region fallthrough
CT: control target
= control target key end

     0   :  { %19 = vsyncpa [#allocation4], 0  ;;  %s7220_s25 = smov 0   ;;  %s8223_s0 = inlined_call_operand.vmem [shape: f32[8,2,16], index: 0, kind: input, shape index: {}]   ;;  %s8224_s1 = inlined_call_operand.vmem [shape: f32[2,8,32], index: 1, kind: input, shape index: {}]   ;;  %s8225_s2 = inlined_call_operand.vmem [shape: f32[2,8,64], index: 2, kind: input, shape index: {}]   ;;  %s8226_s3 = inlined_call_operand.vmem [shape: f32[2,32], index: 3, kind: input, shape index: {}]   ;;  %s8227_s4 = inlined_call_operand.vmem [shape: f32[3,16,32], index: 4, kind: input, shape index: {}]   ;;  %s8228_s5 = inlined_call_operand.vmem [shape: f32[3,64,32], index: 5, kind: input, shape index: {}]   ;;  %s8229_s6 = inlined_call_operand.vmem [shape: f32[3,32,32], index: 6, kind: input, shape index: {}]   ;;  %s8230_s7 = inlined_call_operand.vmem [shape: f32[3,1,32], index: 7, kind: input, shape index: {}]   ;;  %s8231_s8 = inlined_call_operand.vmem [shape: f32[3,1,32], index: 8, kind: input, shape index: {}]   ;;  %s8232_s9 = inlined_call_operand.vmem [shape: f32[16,32], index: 9, kind: input, shape index: {}]   ;;  %s8233_s10 = inlined_call_operand.vmem [shape: f32[32,32], index: 10, kind: input, shape index: {}]   ;;  %s8234_s11 = inlined_call_operand.vmem [shape: f32[64,32], index: 11, kind: input, shape index: {}]   ;;  %s8235_s12 = inlined_call_operand.vmem [shape: f32[8,2,32], index: 12, kind: output, shape index: {0}]   ;;  %s8236_s13 = inlined_call_operand.hbm [shape: f32[2,32], index: 13, kind: output, shape index: {1}]  }
   0x1 LB: > { %s7226_s26 = sadd.s32 4294967295, %s7143_s25   ;;  %p5550_p0 = scmp.ge.s32.totalorder %s7143_s25, 1  ;;  %s7143_s25 = sphi %s7220_s25, %s25_s25  }
   0x2   : > { %p387_p1 = scmp.lt.s32.totalorder %s7143_s25, 3 }
   0x4   : > { %p388_p2 = pnand %p5550_p0, %p387_p1 }
   0x5   : > { %s7231_s27 = sshll.u32 (!%p388_p2), %s7226_s26, 2  ;;  %p5555_p4 = scmp.ne.s32.totalorder (!%p388_p2), %s7226_s26, 0 }
   0x6   : > { %391 = sbr.rel (%p388_p2) target bundleno = 3743 (0xe9f), region = 68  ;;  %p432_p3 = scmp.lt.s32.totalorder (!%p388_p2), %s7231_s27, 7 }
   0xd   : > { %s433_s28 = scalar_select %p432_p3, %s7231_s27, 7 }
   0xe   : > { %446 = sbr.rel (%p5555_p4) target bundleno = 21 (0x15), region = 72  ;;  %v447_v0 = vld [vmem:[%s8226_s3] sm:$0x3] (!%p5555_p4)  ;;  %vm448_vm0 = vcmask (!%p5555_p4), 254976  }
   0xf   : > { %s5552_s29 = sshll.u32 %s433_s28, 1  ;;  %449 = vst.msk [vmem:[#allocation2] sm:$0x3] (!%p5555_p4), %vm448_vm0, %v447_v0 }
  0x10   : > { %s7238_s15 = scalar_lea.vmem %s8223_s0, %s5552_s29  ;;  %s7243_s18 = scalar_lea.vmem %s8235_s12, %s5552_s29 }
  0x15 PF: > { %v7252_v1 = vld [vmem:[%s8224_s1] sm:$0xff]  ;;  %vm553_vm1 = vcmask 261120   ;;  %v534_v2 = vlaneseq  ;;  %v7145_v3 = vmov 0.0   ;;  %vm7146_vm2 = vmmov 0   ;;  %v7276_v13 = vld [vmem:[%s8224_s1 + $0x8] sm:$0xff]  ;;  %v464_v42 = vld [vmem:[%s8228_s5 + $0x10] sm:$0xff] }
  0x16   : > { %5986 = vmatprep.subr.mxu0 %v7145_v3  ;;  %5988 = vmatprep.mubr.msk.f32.mxu0 %vm7146_vm2, %v7145_v3  ;;  %v7147_v4 = vmov 1966171168   ;;  %v7265_v8 = vld [vmem:[#allocation2] sm:$0x3]  ;;  %vm704_vm3 = vcmask 57344   ;;  %v7293_v21 = vld [vmem:[%s8225_s2 + $0x8] sm:$0xff] }
  0x17   : > { %5987 = vmatpush3.xpose.msk.msra.mxu0 %vm553_vm1, %v7252_v1  ;;  %v532_v5 = vunpack.c.l.s4 %v7147_v4  ;;  %v7259_v6 = vshrl.u32 %v534_v2, 7  ;;  %6001 = vmatprep.subr.mxu1 %v7145_v3  ;;  %v7298_v22 = vld [vmem:[%s8225_s2] sm:$0xff]  ;;  %vm723_vm4 = vcmask 64512   ;;  %v455_v34 = vld [vmem:[%s8227_s4 + $0x8] sm:$0xff]  ;;  %v7148_v36 = vmov 0.0|0.0   ;;  %v465_v43 = vld [vmem:[%s8228_s5 + $0x18] sm:$0xff] }
  0x18   : > { %5991 = vmatprep.subr.mxu0 %v7145_v3  ;;  %6003 = vmatprep.mubr.msk.f32.mxu1 %vm7146_vm2, %v7145_v3  ;;  %v454_v33 = vld [vmem:[%s8227_s4] sm:$0xff]  ;;  %v463_v38 = vld [vmem:[%s8228_s5 + $0x8] sm:$0xff]  ;;  %vm952_vm5 = vcmask 130048   ;;  %v7348_v46 = vpack.c.bf16 %v465_v43, %v464_v42  ;;  %v5562_v47 = vld [vmem:[%s8228_s5 + $0x50] sm:$0xff]  ;;  %vm877_vm6 = vcmask 1041409   ;;  %vm879_vm7 = vcmask 523264  }
  0x19   : > { %v533_v7 = vunpack.c.0.s8 %v532_v5  ;;  %6002 = vmatpush3.msra.mxu1 %v7293_v21  ;;  %v462_v35 = vld [vmem:[%s8228_s5] sm:$0xff]  ;;  %v7320_v37 = vpack.c.bf16 %v455_v34, %v454_v33  ;;  %v5561_v41 = vld [vmem:[%s8228_s5 + $0x48] sm:$0xff]  ;;  %v5563_v48 = vld [vmem:[%s8228_s5 + $0x58] sm:$0xff]  ;;  %p1783_p5 = scmp.lt.s32.totalorder %s7231_s27, 6  ;;  %vm1780_vm9 = vcmask 254976   ;;  %s3006_s22 = sadd.s32 1, %s7231_s27 }
  0x1a   : > { %6670 = vmatprep.subr.bf16.mxu1 %v7148_v36  ;;  %v5560_v39 = vld [vmem:[%s8228_s5 + $0x40] sm:$0xff]  ;;  %v7329_v40 = vpack.c.bf16 %v463_v38, %v462_v35  ;;  %v7360_v49 = vpack.c.bf16 %v5563_v48, %v5562_v47  ;;  %v467_v51 = vld [vmem:[%s8228_s5 + $0x28] sm:$0xff]  ;;  %v468_v56 = vld [vmem:[%s8228_s5 + $0x30] sm:$0xff]  ;;  %p3007_p6 = scmp.lt.s32.totalorder %s3006_s22, 6  ;;  %s4230_s14 = sadd.s32 2, %s7231_s27 }
  0x1b   : > { %v7268_v9 = vsub.s32 %v533_v7, %v7259_v6  ;;  %v7342_v44 = vld [vmem:[%s7238_s15] sm:$0x3]  ;;  %v7344_v45 = vpack.c.bf16 %v5561_v41, %v5560_v39  ;;  %v5565_v54 = vld [vmem:[%s8228_s5 + $0x68] sm:$0xff]  ;;  %v469_v57 = vld [vmem:[%s8228_s5 + $0x38] sm:$0xff]  ;;  %s1784_s28 = scalar_select %p1783_p5, 1, 0 }
  0x1c   : > { %v466_v50 = vld [vmem:[%s8228_s5 + $0x20] sm:$0xff]  ;;  %v7394_v58 = vpack.c.bf16 %v469_v57, %v468_v56  ;;  %v5566_v59 = vld [vmem:[%s8228_s5 + $0x70] sm:$0xff]  ;;  %v5567_v60 = vld [vmem:[%s8228_s5 + $0x78] sm:$0xff]  ;;  %s3008_s23 = scalar_select %p3007_p6, 1, 0 }
  0x1d   : > { %v537_v10 = vrot.slane %v7265_v8, %v7268_v9  ;;  %v7375_v52 = vpack.c.bf16 %v467_v51, %v466_v50  ;;  %v5564_v53 = vld [vmem:[%s8228_s5 + $0x60] sm:$0xff]  ;;  %v7403_v61 = vpack.c.bf16 %v5567_v60, %v5566_v59  ;;  %v5583_v33 = vld [vmem:[%s8229_s6 + $0x58] sm:$0xff]  ;;  %v5577_v38 = vld [vmem:[%s8229_s6 + $0x28] sm:$0xff]  ;;  %p4231_p7 = scmp.lt.s32.totalorder %s4230_s14, 6  ;;  %p5677_p9 = scmp.ne.s32.totalorder %s7226_s26, 1 }
  0x1e   : > { %v7383_v55 = vpack.c.bf16 %v5565_v54, %v5564_v53  ;;  %v488_v7 = vld [vmem:[%s8229_s6] sm:$0xff]  ;;  %v5578_v42 = vld [vmem:[%s8229_s6 + $0x30] sm:$0xff]  ;;  %v5579_v43 = vld [vmem:[%s8229_s6 + $0x38] sm:$0xff] }
  0x1f   : > { %v538_v11 = vcombine.high %v537_v10, %v537_v10  ;;  %v545_v12 = vrot.slane %v537_v10, %v7268_v9  ;;  %v489_v10 = vld [vmem:[%s8229_s6 + $0x8] sm:$0xff]  ;;  %v5576_v35 = vld [vmem:[%s8229_s6 + $0x20] sm:$0xff]  ;;  %v7505_v47 = vpack.c.bf16 %v5579_v43, %v5578_v42  ;;  %v5570_v54 = vld [vmem:[%s8228_s5 + $0x90] sm:$0xff]  ;;  %s4232_s16 = scalar_select %p4231_p7, 1, 0 }
  0x20   : > { %v7491_v41 = vpack.c.bf16 %v5577_v38, %v5576_v35  ;;  %v5568_v48 = vld [vmem:[%s8228_s5 + $0x80] sm:$0xff]  ;;  %v5569_v50 = vld [vmem:[%s8228_s5 + $0x88] sm:$0xff]  ;;  %v5571_v56 = vld [vmem:[%s8228_s5 + $0x98] sm:$0xff] }
  0x21   : > { %5989 = vmatmul.mubr.msk.f32.vlgmr.msra.gmra.mrb[0].mxu0 %vm553_vm1, %v545_v12  ;;  %v552_v14 = vrot.slane %v538_v11, %v7268_v9  ;;  %v5558_v11 = vld [vmem:[%s8227_s4 + $0x20] sm:$0xff]  ;;  %v5559_v12 = vld [vmem:[%s8227_s4 + $0x28] sm:$0xff]  ;;  %v7521_v51 = vpack.c.bf16 %v5569_v50, %v5568_v48  ;;  %v7533_v59 = vpack.c.bf16 %v5571_v56, %v5570_v54 }
  0x22   : > { %5992 = vmatpush3.xpose.msk.msra.mxu0 %vm553_vm1, %v7276_v13  ;;  %5993 = vmatprep.mubr.msk.f32.mxu0 %vm7146_vm2, %v7145_v3  ;;  %v5572_v60 = vld [vmem:[%s8228_s5 + $0xa0] sm:$0xff] }
  0x23   : > { %5996 = vmatprep.subr.mxu0 %v7145_v3  ;;  %v5584_v50 = vld [vmem:[%s8230_s7 + $0x1] sm:$0x1] }
  0x25   : > { %5994 = vmatmul.mubr.msk.f32.vlgmr.msra.gmra.mrb[2].mxu0 %vm553_vm1, %v552_v14 }
  0x26   : > { %5998 = vmatprep.mubr.msk.f32.mxu0 %vm7146_vm2, %v7145_v3  ;;  %5997 = vmatpush3.msra.mxu0 %v7298_v22 }
  0x27   : > { %6658 = vmatprep.subr.bf16.mxu0 %v7148_v36 }
  0xf4   : > { %v625_v15 = vpop.f32.mrb[0].mxu0 }
  0xf5   : > { %v5990_v16 = vpop.f32.mrb[1].mxu0  ;;  %v705_v20 = vsel %vm704_vm3, %v625_v15, -inf }
  0xf8   : > { %v700_v17 = vpop.f32.mrb[2].mxu0 }
  0xf9   : > { %v5995_v18 = vpop.f32.mrb[3].mxu0  ;;  %v708_v19 = vsel %vm704_vm3, %v700_v17, -inf }
  0xfa   : > { %709 = vmax.xlane.f32.xlu0 %v708_v19  ;;  %v7421_v19 = vpack.c.bf16 %v489_v10, %v488_v7  ;;  %v517_v7 = vld [vmem:[%s8233_s10 + $0x8] sm:$0xff]  ;;  %v518_v10 = vld [vmem:[%s8233_s10 + $0x10] sm:$0xff] }
  0xfe   : > { %706 = vmax.xlane.f32.xlu0 %v705_v20  ;;  %v490_v20 = vld [vmem:[%s8229_s6 + $0x10] sm:$0xff] }
 0x187   : > { %v710_v23 = vpop.xlane.xlu0 %709 }
 0x188   : > { %v712_v24 = vsub.f32 %v700_v17, %v710_v23  ;;  %v491_v23 = vld [vmem:[%s8229_s6 + $0x18] sm:$0xff] }
 0x18a   : > { %v715_v25 = vmul.f32 1.442695, %v712_v24  ;;  %v7429_v24 = vpack.c.bf16 %v5559_v12, %v5558_v11  ;;  %v519_v12 = vld [vmem:[%s8233_s10 + $0x18] sm:$0xff] }
 0x18b   : > { %v707_v26 = vpop.xlane.xlu0 %706 }
 0x18c   : > { %7029 = vpow2.f32 %v715_v25  ;;  %v711_v27 = vsub.f32 %v625_v15, %v707_v26  ;;  %v5580_v26 = vld [vmem:[%s8229_s6 + $0x40] sm:$0xff] }
 0x18e   : > { %v713_v28 = vmul.f32 1.442695, %v711_v27  ;;  %v5581_v27 = vld [vmem:[%s8229_s6 + $0x48] sm:$0xff] }
 0x190   : > { %7031 = vpow2.f32 %v713_v28  ;;  %v7445_v28 = vpack.c.bf16 %v491_v23, %v490_v20 }
 0x196   : > { %v7030_v29 = vpop.eup %7029 }
 0x197   : > { %6004 = vmatmul.mubr.msk.f32.vlgmr.msra.gmra.mrb[0].mxu1 %vm723_vm4, %v7030_v29  ;;  %v720_v30 = vsel %vm704_vm3, %v7030_v29, 0.0  ;;  %v5556_v29 = vld [vmem:[%s8227_s4 + $0x10] sm:$0xff] }
 0x198   : > { %721 = vadd.xlane.f32.xlu1 %v720_v30  ;;  %6029 = vmatprep.mubr.msk.f32.mxu1 %vm7146_vm2, %v7145_v3  ;;  %v5557_v30 = vld [vmem:[%s8227_s4 + $0x18] sm:$0xff] }
 0x199   : > { %6672 = vmatpush3.bf16.msra.mxu1 %v7320_v37  ;;  %v7469_v34 = vpack.c.bf16 %v5557_v30, %v5556_v29  ;;  %v1102_v29 = vsub.s32 0, %v7259_v6 }
 0x19a   : > { %v7032_v31 = vpop.eup %7031  ;;  %6679 = vmatprep.subr.bf16.mxu1 %v7148_v36 }
 0x19b   : > { %5999 = vmatmul.mubr.msk.f32.vlgmr.msra.gmra.mrb[4].mxu0 %vm723_vm4, %v7032_v31  ;;  %v717_v32 = vsel %vm704_vm3, %v7032_v31, 0.0  ;;  %v7457_v31 = vpack.c.bf16 %v5581_v27, %v5580_v26 }
 0x19c   : > { %718 = vadd.xlane.f32.xlu1 %v717_v32  ;;  %6022 = vmatprep.mubr.msk.f32.mxu0 %vm7146_vm2, %v7145_v3  ;;  %v5582_v32 = vld [vmem:[%s8229_s6 + $0x50] sm:$0xff] }
 0x19d   : > { %6660 = vmatpush3.bf16.msra.mxu0 %v7329_v40  ;;  %6030 = vmatmul.mubr.msk.f32.vlgmr.msra.gmra.mrb[2].mxu1 %vm952_vm5, %v7342_v44  ;;  %v7481_v39 = vpack.c.bf16 %v5583_v33, %v5582_v32 }
 0x19e   : > { %6661 = vmatprep.subr.bf16.mxu0 %v7148_v36  ;;  %6681 = vmatpush3.bf16.msra.mxu1 %v7344_v45 }
 0x19f   : > { %6059 = vmatprep.mubr.msk.f32.mxu1 %vm7146_vm2, %v7145_v3  ;;  %6682 = vmatprep.subr.bf16.mxu1 %v7148_v36 }
 0x1a1   : > { %6663 = vmatpush3.bf16.msra.mxu0 %v7348_v46 }
 0x1a2   : > { %6664 = vmatprep.subr.bf16.mxu0 %v7148_v36  ;;  %6684 = vmatpush3.bf16.msra.mxu1 %v7360_v49 }
 0x1a3   : > { %6685 = vmatprep.subr.bf16.mxu1 %v7148_v36 }
 0x1a5   : > { %6666 = vmatpush3.bf16.msra.mxu0 %v7375_v52 }
 0x1a6   : > { %6687 = vmatpush3.bf16.msra.mxu1 %v7383_v55  ;;  %6667 = vmatprep.subr.bf16.mxu0 %v7148_v36 }
 0x1a7   : > { %6688 = vmatprep.subr.bf16.mxu1 %v7148_v36 }
 0x1a9   : > { %6669 = vmatpush3.bf16.msra.mxu0 %v7394_v58 }
 0x1aa   : > { %6690 = vmatpush3.bf16.msra.mxu1 %v7403_v61  ;;  %6673 = vmatprep.subr.bf16.mxu0 %v7148_v36 }
 0x1ab   : > { %6712 = vmatprep.subr.bf16.mxu1 %v7148_v36 }
 0x225   : > { %v722_v62 = vpop.xlane.xlu1 %721 }
 0x226   : > { %7033 = vrcp.f32 %v722_v62  ;;  %v5573_v62 = vld [vmem:[%s8228_s5 + $0xa8] sm:$0xff] }
 0x229   : > { %v719_v63 = vpop.xlane.xlu1 %718 }
 0x22a   : > { %7035 = vrcp.f32 %v719_v63  ;;  %v7545_v63 = vpack.c.bf16 %v5573_v62, %v5572_v60 }
 0x230   : > { %v7034_v0 = vpop.eup %7033 }
 0x234   : > { %v7036_v14 = vpop.eup %7035 }
 0x26a   : > { %v866_v2 = vpop.f32.mrb[0].mxu1 }
 0x26b   : > { %v873_v4 = vmul.f32 %v7034_v0, %v866_v2  ;;  %v6005_v5 = vpop.f32.mrb[1].mxu1  ;;  %v5574_v0 = vld [vmem:[%s8228_s5 + $0xb0] sm:$0xff]  ;;  %v5575_v2 = vld [vmem:[%s8228_s5 + $0xb8] sm:$0xff] }
 0x26c   : > { %v516_v5 = vld [vmem:[%s8233_s10] sm:$0xff] }
 0x26d   : > { %v876_v16 = vrot.slane %v873_v4, 7  ;;  %v7555_v4 = vpack.c.bf16 %v5575_v2, %v5574_v0  ;;  %v7576_v11 = vpack.c.bf16 %v517_v7, %v516_v5 }
 0x26e   : > { %v793_v15 = vpop.f32.mrb[4].mxu0 }
 0x26f   : > { %v871_v17 = vmul.f32 %v7036_v14, %v793_v15  ;;  %v6000_v18 = vpop.f32.mrb[5].mxu0  ;;  %v7582_v14 = vpack.c.bf16 %v519_v12, %v518_v10 }
 0x270   : > { %v1022_v53 = vpop.f32.mrb[2].mxu1  ;;  %v503_v18 = vld [vmem:[%s8231_s8] sm:$0x1] }
 0x271   : > { %v7432_v25 = vsel %vm877_vm6, %v876_v16, %v871_v17  ;;  %v6031_v57 = vpop.f32.mrb[3].mxu1  ;;  %v502_v17 = vld [vmem:[%s8230_s7] sm:$0x1] }
 0x272   : > { %6023 = vmatmul.mubr.msk.f32.vlgmr.msra.gmra.mrb[6].mxu0 %vm879_vm7, %v7432_v25  ;;  %6060 = vmatmul.mubr.msk.f32.vlgmr.msra.gmra.mrb[4].mxu1 %vm879_vm7, %v7432_v25  ;;  %v504_v27 = vadd.f32 %v503_v18, %v502_v17 }
 0x273   : > { %6675 = vmatpush3.bf16.msra.mxu0 %v7421_v19  ;;  %6040 = vmatprep.mubr.msk.f32.mxu0 %vm7146_vm2, %v7145_v3 }
 0x274   : > { %6676 = vmatprep.subr.bf16.mxu0 %v7148_v36  ;;  %6714 = vmatpush3.bf16.msra.mxu1 %v7429_v24  ;;  %v7594_v33 = vrot.slane %v504_v27, %v1102_v29 }
 0x275   : > { %6103 = vmatprep.mubr.msk.f32.mxu1 %vm7146_vm2, %v7145_v3  ;;  %6715 = vmatprep.subr.bf16.mxu1 %v7148_v36 }
 0x277   : > { %6678 = vmatpush3.bf16.msra.mxu0 %v7445_v28  ;;  %6104 = vmatmul.mubr.msk.f32.vlgmr.msra.gmra.mrb[6].mxu1 %vm952_vm5, %v7342_v44 }
 0x278   : > { %6691 = vmatprep.subr.bf16.mxu0 %v7148_v36  ;;  %6717 = vmatpush3.bf16.msra.mxu1 %v7457_v31 }
 0x279   : > { %6718 = vmatprep.subr.bf16.mxu1 %v7148_v36  ;;  %6114 = vmatprep.mubr.msk.f32.mxu1 %vm7146_vm2, %v7145_v3 }
 0x27a   : > { %6041 = vmatmul.mubr.msk.f32.vlgmr.msra.gmra.mrb[8].mxu0 %vm553_vm1, %v7265_v8 }
 0x27b   : > { %6693 = vmatpush3.bf16.msra.mxu0 %v7469_v34  ;;  %6066 = vmatprep.mubr.msk.f32.mxu0 %vm7146_vm2, %v7145_v3 }
 0x27c   : > { %6694 = vmatprep.subr.bf16.mxu0 %v7148_v36  ;;  %6720 = vmatpush3.bf16.msra.mxu1 %v7481_v39 }
 0x27d   : > { %6721 = vmatprep.subr.bf16.mxu1 %v7148_v36 }
 0x27e   : > { %6067 = vmatmul.mubr.msk.f32.vlgmr.msra.gmra.mrb[10].mxu0 %vm952_vm5, %v7342_v44 }
 0x27f   : > { %6696 = vmatpush3.bf16.msra.mxu0 %v7491_v41  ;;  %6077 = vmatprep.mubr.msk.f32.mxu0 %vm7146_vm2, %v7145_v3 }
 0x280   : > { %6697 = vmatprep.subr.bf16.mxu0 %v7148_v36  ;;  %6115 = vmatmul.mubr.msk.f32.vlgmr.msra.gmra.mrb[8].mxu1 %vm553_vm1, %v7265_v8 }
 0x281   : > { %6125 = vmatprep.mubr.msk.f32.mxu1 %vm7146_vm2, %v7145_v3  ;;  %6723 = vmatpush3.bf16.msra.mxu1 %v7576_v11 }
 0x282   : > { %6724 = vmatprep.subr.bf16.mxu1 %v7148_v36 }
 0x283   : > { %6699 = vmatpush3.bf16.msra.mxu0 %v7505_v47 }
 0x284   : > { %6700 = vmatprep.subr.bf16.mxu0 %v7148_v36 }
 0x285   : > { %6726 = vmatpush3.bf16.msra.mxu1 %v7582_v14 }
 0x286   : > { %6078 = vmatmul.mubr.msk.f32.vlgmr.msra.gmra.mrb[12].mxu0 %vm553_vm1, %v7265_v8  ;;  %6727 = vmatprep.subr.bf16.mxu1 %v7148_v36 }
 0x287   : > { %6702 = vmatpush3.bf16.msra.mxu0 %v7521_v51  ;;  %6096 = vmatprep.mubr.msk.f32.mxu0 %vm7146_vm2, %v7145_v3 }
 0x288   : > { %6703 = vmatprep.subr.bf16.mxu0 %v7148_v36 }
 0x28b   : > { %6705 = vmatpush3.bf16.msra.mxu0 %v7533_v59 }
 0x28c   : > { %6706 = vmatprep.subr.bf16.mxu0 %v7148_v36 }
 0x28f   : > { %6708 = vmatpush3.bf16.msra.mxu0 %v7545_v63 }
 0x290   : > { %6709 = vmatprep.subr.bf16.mxu0 %v7148_v36 }
 0x293   : > { %6711 = vmatpush3.bf16.msra.mxu0 %v7555_v4 }
 0x294   : > { %6154 = vmatprep.subr.mxu0 %v7145_v3 }
 0x296   : > { %6097 = vmatmul.mubr.msk.f32.vlgmr.msra.gmra.mrb[14].mxu0 %vm879_vm7, %v7432_v25 }
 0x297   : > { %6156 = vmatprep.mubr.msk.f32.mxu0 %vm7146_vm2, %v7145_v3 }
 0x29c   : > { %6155 = vmatpush3.xpose.msk.msra.mxu0 %vm553_vm1, %v7252_v1 }
 0x29d   : > { %6159 = vmatprep.subr.mxu0 %v7145_v3 }
 0x345   : > { %v948_v15 = vpop.f32.mrb[6].mxu0  ;;  %v1178_v16 = vpop.f32.mrb[4].mxu1 }
 0x346   : > { %v1023_v20 = vadd.f32 %v1022_v53, %v948_v15  ;;  %v6024_v23 = vpop.f32.mrb[7].mxu0  ;;  %v6061_v26 = vpop.f32.mrb[5].mxu1  ;;  %v5585_v53 = vld [vmem:[%s8231_s8 + $0x1] sm:$0x1] }
 0x347   : > { %v509_v60 = vadd.f32 %v5585_v53, %v5584_v50  ;;  %v1785_v53 = vstv %s1784_s28  ;;  %s5454_s28 = sadd.s32 3, %s7231_s27 }
 0x348   : > { %vm1786_vm8 = vcmp.eq.s32.totalorder %v1785_v53, 1  ;;  %p5455_p8 = scmp.lt.s32.totalorder %s5454_s28, 6 }
 0x349   : > { %v7603_v0 = vrot.slane %v509_v60, %v1102_v29 }
 0x34a   : > { %v1472_v30 = vpop.f32.mrb[6].mxu1  ;;  %s5456_s29 = scalar_select %p5455_p8, 1, 0 }
 0x34b   : > { %v6105_v32 = vpop.f32.mrb[7].mxu1 }
 0x34d   : > { %v1094_v35 = vpop.f32.mrb[8].mxu0 }
 0x34e   : > { %v1098_v38 = vadd.f32 %v1094_v35, %v1023_v20  ;;  %v6042_v42 = vpop.f32.mrb[9].mxu0  ;;  %v7615_v20 = vld [vmem:[%s8230_s7 + $0x2] ss:$0 sm:$0xff] }
 0x350   : > { %v1105_v43 = vadd.f32 %v7594_v33, %v1098_v38 }
 0x351   : > { %v1248_v48 = vpop.f32.mrb[10].mxu0 }
 0x352   : > { %v5597_v54 = vmul.f32 -1.442695, %v1105_v43  ;;  %v1249_v6 = vadd.f32 %v1248_v48, %v1178_v16  ;;  %v6068_v56 = vpop.f32.mrb[11].mxu0  ;;  %v7609_v16 = vld [vmem:[%s8231_s8 + $0x2] ss:$0 sm:$0xff] }
 0x353   : > { %v1555_v57 = vpop.f32.mrb[8].mxu1 }
 0x354   : > { %7037 = vpow2.f32 %v5597_v54  ;;  %v6116_v62 = vpop.f32.mrb[9].mxu1  ;;  %v1556_v18 = vadd.f32 %v7609_v16, %v1555_v57  ;;  %v514_v54 = vld [vmem:[%s8232_s9] sm:$0xff] }
 0x359   : > { %v1318_v2 = vpop.f32.mrb[12].mxu0 }
 0x35a   : > { %v1322_v5 = vadd.f32 %v1318_v2, %v1249_v6  ;;  %v6079_v7 = vpop.f32.mrb[13].mxu0 }
 0x35b   : > { %v520_v7 = vld [vmem:[%s8234_s11] sm:$0xff] }
 0x35c   : > { %v1329_v10 = vadd.f32 %v7603_v0, %v1322_v5 }
 0x35e   : > { %v7038_v12 = vpop.eup %7037  ;;  %v5601_v15 = vmul.f32 -1.442695, %v1329_v10  ;;  %v521_v10 = vld [vmem:[%s8234_s11 + $0x8] sm:$0xff] }
 0x35f   : > { %v1109_v17 = vadd.f32 1.0, %v7038_v12 }
 0x360   : > { %7039 = vpow2.f32 %v5601_v15  ;;  %v7646_v15 = vpack.c.bf16 %v521_v10, %v520_v7 }
 0x361   : > { %7041 = vrcp.f32 %v1109_v17  ;;  %v522_v17 = vld [vmem:[%s8234_s11 + $0x10] sm:$0xff] }
 0x369   : > { %v1402_v23 = vpop.f32.mrb[14].mxu0 }
 0x36a   : > { %v7040_v26 = vpop.eup %7039  ;;  %v1473_v27 = vadd.f32 %v1472_v30, %v1402_v23  ;;  %v6098_v29 = vpop.f32.mrb[15].mxu0  ;;  %v515_v30 = vld [vmem:[%s8232_s9 + $0x8] sm:$0xff] }
 0x36b   : > { %v7042_v32 = vpop.eup %7041  ;;  %v1333_v35 = vadd.f32 1.0, %v7040_v26  ;;  %v7626_v60 = vpack.c.bf16 %v515_v30, %v514_v54  ;;  %v525_v29 = vld [vmem:[%s8234_s11 + $0x28] sm:$0xff] }
 0x36c   : > { %v1559_v38 = vmul.f32 %v7042_v32, %v1556_v18  ;;  %v1482_v42 = vadd.f32 %v7615_v20, %v1473_v27  ;;  %v523_v18 = vld [vmem:[%s8234_s11 + $0x18] sm:$0xff]  ;;  %v524_v27 = vld [vmem:[%s8234_s11 + $0x20] sm:$0xff]  ;;  %v526_v32 = vld [vmem:[%s8234_s11 + $0x30] sm:$0xff] }
 0x36d   : > { %7043 = vrcp.f32 %v1333_v35  ;;  %v7664_v26 = vpack.c.bf16 %v523_v18, %v522_v17  ;;  %v527_v35 = vld [vmem:[%s8234_s11 + $0x38] sm:$0xff] }
 0x36e   : > { %v1560_v43 = vadd.f32 %v1559_v38, %v1482_v42  ;;  %v7690_v38 = vpack.c.bf16 %v527_v35, %v526_v32  ;;  %v7701_v42 = vld [vmem:[%s7238_s15 + $0x2] sm:$0x3] }
 0x370   : > { %7045 = vtanh.f32 %v1560_v43 }
 0x377   : > { %v7044_v48 = vpop.eup %7043 }
 0x378   : > { %v1562_v50 = vsub.f32 1.0, %v7044_v48  ;;  %v1564_v57 = vmul.f32 %v7044_v48, %v7265_v8 }
 0x37a   : > { %v7046_v6 = vpop.eup %7045 }
 0x37b   : > { %v1563_v56 = vmul.f32 %v7046_v6, %v1562_v50 }
 0x37d   : > { %v1565_v62 = vadd.f32 %v1564_v57, %v1563_v56 }
 0x37f   : > { %6126 = vmatmul.mubr.msk.f32.vlgmr.msra.gmra.mrb[10].mxu1 %vm553_vm1, %v1565_v62  ;;  %v7630_v2 = vsel %vm1786_vm8, %v1565_v62, %v7265_v8 }
 0x380   : > { %6729 = vmatpush3.bf16.msra.mxu1 %v7626_v60  ;;  %v1797_v5 = vrot.slane %v7630_v2, %v7268_v9  ;;  %6132 = vmatprep.mubr.msk.f32.mxu1 %vm7146_vm2, %v7145_v3 }
 0x381   : > { %6730 = vmatprep.subr.bf16.mxu1 %v7148_v36 }
 0x382   : > { %v1805_v8 = vrot.slane %v1797_v5, %v7268_v9  ;;  %v1798_v12 = vcombine.high %v1797_v5, %v1797_v5 }
 0x384   : > { %6157 = vmatmul.mubr.msk.f32.vlgmr.msra.gmra.mrb[16].mxu0 %vm553_vm1, %v1805_v8  ;;  %v1812_v23 = vrot.slane %v1798_v12, %v7268_v9 }
 0x385   : > { %6160 = vmatpush3.xpose.msk.msra.mxu0 %vm553_vm1, %v7276_v13  ;;  %6161 = vmatprep.mubr.msk.f32.mxu0 %vm7146_vm2, %v7145_v3 }
 0x386   : > { %6164 = vmatprep.subr.mxu0 %v7145_v3 }
 0x387   : > { %6133 = vmatmul.mubr.msk.f32.vlgmr.msra.gmra.mrb[10].mxu1 %vm952_vm5, %v7342_v44  ;;  %v7680_v44 = vpack.c.bf16 %v525_v29, %v524_v27 }
 0x388   : > { %6732 = vmatpush3.bf16.msra.mxu1 %v7646_v15  ;;  %6162 = vmatmul.mubr.msk.f32.vlgmr.msra.gmra.mrb[18].mxu0 %vm553_vm1, %v1812_v23 }
 0x389   : > { %6733 = vmatprep.subr.bf16.mxu1 %v7148_v36  ;;  %6151 = vmatprep.mubr.msk.f32.mxu1 %vm7146_vm2, %v7145_v3 }
 0x38a   : > { %6165 = vmatpush3.msra.mxu0 %v7298_v22  ;;  %6166 = vmatprep.mubr.msk.f32.mxu0 %vm7146_vm2, %v7145_v3 }
 0x38b   : > { %6169 = vmatprep.subr.mxu0 %v7145_v3 }
 0x38c   : > { %6735 = vmatpush3.bf16.msra.mxu1 %v7664_v26 }
 0x38d   : > { %6736 = vmatprep.subr.bf16.mxu1 %v7148_v36 }
 0x390   : > { %6738 = vmatpush3.bf16.msra.mxu1 %v7680_v44 }
 0x391   : > { %6739 = vmatprep.subr.bf16.mxu1 %v7148_v36 }
 0x394   : > { %6741 = vmatpush3.bf16.msra.mxu1 %v7690_v38 }
 0x395   : > { %6754 = vmatprep.subr.bf16.mxu1 %v7148_v36 }
 0x397   : > { %6152 = vmatmul.mubr.msk.f32.vlgmr.msra.gmra.mrb[10].mxu1 %vm879_vm7, %v7432_v25 }
 0x398   : > { %6756 = vmatpush3.bf16.msra.mxu1 %v7320_v37  ;;  %6197 = vmatprep.mubr.msk.f32.mxu1 %vm7146_vm2, %v7145_v3 }
 0x399   : > { %6757 = vmatprep.subr.bf16.mxu1 %v7148_v36 }
 0x39b   : > { %6198 = vmatmul.mubr.msk.f32.vlgmr.msra.gmra.mrb[12].mxu1 %vm952_vm5, %v7701_v42 }
 0x39c   : > { %6759 = vmatpush3.bf16.msra.mxu1 %v7421_v19  ;;  %6208 = vmatprep.mubr.msk.f32.mxu1 %vm7146_vm2, %v7145_v3 }
 0x39d   : > { %6760 = vmatprep.subr.bf16.mxu1 %v7148_v36 }
 0x3a0   : > { %6762 = vmatpush3.bf16.msra.mxu1 %v7445_v28 }
 0x3a1   : > { %6775 = vmatprep.subr.bf16.mxu1 %v7148_v36 }
 0x3a3   : > { %6209 = vmatmul.mubr.msk.f32.vlgmr.msra.gmra.mrb[14].mxu1 %vm553_vm1, %v7630_v2 }
 0x3a4   : > { %6777 = vmatpush3.bf16.msra.mxu1 %v7469_v34  ;;  %6234 = vmatprep.mubr.msk.f32.mxu1 %vm7146_vm2, %v7145_v3 }
 0x3a5   : > { %6778 = vmatprep.subr.bf16.mxu1 %v7148_v36 }
 0x3a7   : > { %6235 = vmatmul.mubr.msk.f32.vlgmr.msra.gmra.mrb[16].mxu1 %vm952_vm5, %v7701_v42 }
 0x3a8   : > { %6780 = vmatpush3.bf16.msra.mxu1 %v7491_v41  ;;  %6245 = vmatprep.mubr.msk.f32.mxu1 %vm7146_vm2, %v7145_v3 }
 0x3a9   : > { %6781 = vmatprep.subr.bf16.mxu1 %v7148_v36 }
 0x3ac   : > { %6783 = vmatpush3.bf16.msra.mxu1 %v7505_v47 }
 0x3ad   : > { %6796 = vmatprep.subr.bf16.mxu1 %v7148_v36 }
 0x3af   : > { %6246 = vmatmul.mubr.msk.f32.vlgmr.msra.gmra.mrb[18].mxu1 %vm553_vm1, %v7630_v2 }
 0x3b0   : > { %6798 = vmatpush3.bf16.msra.mxu1 %v7429_v24  ;;  %6271 = vmatprep.mubr.msk.f32.mxu1 %vm7146_vm2, %v7145_v3 }
 0x3b1   : > { %6799 = vmatprep.subr.bf16.mxu1 %v7148_v36 }
 0x3b3   : > { %6272 = vmatmul.mubr.msk.f32.vlgmr.msra.gmra.mrb[20].mxu1 %vm952_vm5, %v7701_v42 }
 0x3b4   : > { %6801 = vmatpush3.bf16.msra.mxu1 %v7457_v31  ;;  %6282 = vmatprep.mubr.msk.f32.mxu1 %vm7146_vm2, %v7145_v3 }
 0x3b5   : > { %6802 = vmatprep.subr.bf16.mxu1 %v7148_v36 }
 0x3b8   : > { %6804 = vmatpush3.bf16.msra.mxu1 %v7481_v39 }
 0x3b9   : > { %6805 = vmatprep.subr.bf16.mxu1 %v7148_v36 }
 0x3bb   : > { %6283 = vmatmul.mubr.msk.f32.vlgmr.msra.gmra.mrb[22].mxu1 %vm553_vm1, %v7630_v2 }
 0x3bc   : > { %6807 = vmatpush3.bf16.msra.mxu1 %v7576_v11  ;;  %6293 = vmatprep.mubr.msk.f32.mxu1 %vm7146_vm2, %v7145_v3 }
 0x3bd   : > { %6808 = vmatprep.subr.bf16.mxu1 %v7148_v36 }
 0x3c0   : > { %6810 = vmatpush3.bf16.msra.mxu1 %v7582_v14 }
 0x3c1   : > { %6811 = vmatprep.subr.bf16.mxu1 %v7148_v36 }
 0x457   : > { %v1881_v25 = vpop.f32.mrb[16].mxu0 }
 0x458   : > { %v6158_v43 = vpop.f32.mrb[17].mxu0  ;;  %v1957_v48 = vsel %vm704_vm3, %v1881_v25, -inf }
 0x459   : > { %1958 = vmax.xlane.f32.xlu0 %v1957_v48 }
 0x45b   : > { %v1953_v50 = vpop.f32.mrb[18].mxu0 }
 0x45c   : > { %v6163_v53 = vpop.f32.mrb[19].mxu0  ;;  %v1960_v54 = vsel %vm704_vm3, %v1953_v50, -inf }
 0x45d   : > { %1961 = vmax.xlane.f32.xlu1 %v1960_v54 }
 0x46a   : > { %v1775_v30 = vpop.f32.mrb[10].mxu1 }
 0x46b   : > { %1781 = vst.msk [vmem:[%s7243_s18] sm:$0x3] %vm1780_vm9, %v1775_v30  ;;  %v6153_v6 = vpop.f32.mrb[11].mxu1 }
 0x46e   : > { %v7752_v56 = vpop.f32.mrb[12].mxu1 }
 0x46f   : > { %v6199_v57 = vpop.f32.mrb[13].mxu1 }
 0x476   : > { %v7754_v62 = vpop.f32.mrb[14].mxu1 }
 0x477   : > { %v6210_v5 = vpop.f32.mrb[15].mxu1 }
 0x47a   : > { %v7756_v7 = vpop.f32.mrb[16].mxu1 }
 0x47b   : > { %v6236_v10 = vpop.f32.mrb[17].mxu1 }
 0x482   : > { %v7758_v8 = vpop.f32.mrb[18].mxu1 }
 0x483   : > { %v6247_v12 = vpop.f32.mrb[19].mxu1 }
 0x486   : > { %v7760_v17 = vpop.f32.mrb[20].mxu1 }
 0x487   : > { %v6273_v18 = vpop.f32.mrb[21].mxu1 }
 0x48e   : > { %v7762_v23 = vpop.f32.mrb[22].mxu1 }
 0x48f   : > { %v6284_v27 = vpop.f32.mrb[23].mxu1 }
 0x4e6   : > { %v1959_v29 = vpop.xlane.xlu0 %1958 }
 0x4e7   : > { %v1963_v32 = vsub.f32 %v1881_v25, %v1959_v29 }
 0x4e9   : > { %v1965_v35 = vmul.f32 1.442695, %v1963_v32 }
 0x4ea   : > { %v1962_v43 = vpop.xlane.xlu1 %1961 }
 0x4eb   : > { %7047 = vpow2.f32 %v1965_v35  ;;  %v1964_v48 = vsub.f32 %v1953_v50, %v1962_v43 }
 0x4ed   : > { %v1967_v53 = vmul.f32 1.442695, %v1964_v48 }
 0x4ef   : > { %7049 = vpow2.f32 %v1967_v53 }
 0x4f5   : > { %v7048_v54 = vpop.eup %7047 }
 0x4f6   : > { %6167 = vmatmul.mubr.msk.f32.vlgmr.msra.gmra.mrb[20].mxu0 %vm723_vm4, %v7048_v54  ;;  %v1969_v30 = vsel %vm704_vm3, %v7048_v54, 0.0 }
 0x4f7   : > { %6170 = vmatpush3.msra.mxu0 %v7293_v21  ;;  %1970 = vadd.xlane.f32.xlu1 %v1969_v30 }
 0x4f8   : > { %6171 = vmatprep.mubr.msk.f32.mxu0 %vm7146_vm2, %v7145_v3  ;;  %6742 = vmatprep.subr.bf16.mxu0 %v7148_v36 }
 0x4f9   : > { %v7050_v25 = vpop.eup %7049 }
 0x4fa   : > { %6172 = vmatmul.mubr.msk.f32.vlgmr.msra.gmra.mrb[22].mxu0 %vm723_vm4, %v7050_v25  ;;  %v1972_v50 = vsel %vm704_vm3, %v7050_v25, 0.0 }
 0x4fb   : > { %1973 = vadd.xlane.f32.xlu0 %v1972_v50  ;;  %6744 = vmatpush3.bf16.msra.mxu0 %v7329_v40 }
 0x4fc   : > { %6745 = vmatprep.subr.bf16.mxu0 %v7148_v36  ;;  %6190 = vmatprep.mubr.msk.f32.mxu0 %vm7146_vm2, %v7145_v3 }
 0x4ff   : > { %6747 = vmatpush3.bf16.msra.mxu0 %v7348_v46 }
 0x500   : > { %6748 = vmatprep.subr.bf16.mxu0 %v7148_v36 }
 0x503   : > { %6750 = vmatpush3.bf16.msra.mxu0 %v7375_v52 }
 0x504   : > { %6751 = vmatprep.subr.bf16.mxu0 %v7148_v36 }
 0x507   : > { %6753 = vmatpush3.bf16.msra.mxu0 %v7394_v58 }
 0x508   : > { %6763 = vmatprep.subr.bf16.mxu0 %v7148_v36 }
 0x584   : > { %v1971_v6 = vpop.xlane.xlu1 %1970 }
 0x588   : > { %v1974_v21 = vpop.xlane.xlu0 %1973 }
 0x589   : > { %7051 = vrcp.f32 %v1974_v21 }
 0x58a   : > { %7053 = vrcp.f32 %v1971_v6 }
 0x593   : > { %v7052_v10 = vpop.eup %7051 }
 0x594   : > { %v7054_v29 = vpop.eup %7053 }
 0x5c9   : > { %v2044_v57 = vpop.f32.mrb[20].mxu0 }
 0x5ca   : > { %v6168_v5 = vpop.f32.mrb[21].mxu0  ;;  %v2122_v32 = vmul.f32 %v7054_v29, %v2044_v57 }
 0x5cd   : > { %v2117_v12 = vpop.f32.mrb[22].mxu0 }
 0x5ce   : > { %v2124_v18 = vmul.f32 %v7052_v10, %v2117_v12  ;;  %v6173_v27 = vpop.f32.mrb[23].mxu0 }
 0x5d0   : > { %v2127_v35 = vrot.slane %v2124_v18, 7 }
 0x5d2   : > { %v7783_v43 = vsel %vm877_vm6, %v2127_v35, %v2122_v32 }
 0x5d3   : > { %6191 = vmatmul.mubr.msk.f32.vlgmr.msra.gmra.mrb[24].mxu0 %vm879_vm7, %v7783_v43 }
 0x5d4   : > { %6765 = vmatpush3.bf16.msra.mxu0 %v7344_v45  ;;  %6227 = vmatprep.mubr.msk.f32.mxu0 %vm7146_vm2, %v7145_v3 }
 0x5d5   : > { %6766 = vmatprep.subr.bf16.mxu0 %v7148_v36 }
 0x5d8   : > { %6768 = vmatpush3.bf16.msra.mxu0 %v7360_v49 }
 0x5d9   : > { %6769 = vmatprep.subr.bf16.mxu0 %v7148_v36 }
 0x5dc   : > { %6771 = vmatpush3.bf16.msra.mxu0 %v7383_v55 }
 0x5dd   : > { %6772 = vmatprep.subr.bf16.mxu0 %v7148_v36 }
 0x5e0   : > { %6774 = vmatpush3.bf16.msra.mxu0 %v7403_v61 }
 0x5e1   : > { %6784 = vmatprep.subr.bf16.mxu0 %v7148_v36 }
 0x5e3   : > { %6228 = vmatmul.mubr.msk.f32.vlgmr.msra.gmra.mrb[26].mxu0 %vm879_vm7, %v7783_v43 }
 0x5e4   : > { %6786 = vmatpush3.bf16.msra.mxu0 %v7521_v51  ;;  %6264 = vmatprep.mubr.msk.f32.mxu0 %vm7146_vm2, %v7145_v3 }
 0x5e5   : > { %6787 = vmatprep.subr.bf16.mxu0 %v7148_v36 }
 0x5e8   : > { %6789 = vmatpush3.bf16.msra.mxu0 %v7533_v59 }
 0x5e9   : > { %6790 = vmatprep.subr.bf16.mxu0 %v7148_v36 }
 0x5ec   : > { %6792 = vmatpush3.bf16.msra.mxu0 %v7545_v63 }
 0x5ed   : > { %6793 = vmatprep.subr.bf16.mxu0 %v7148_v36 }
 0x5f0   : > { %6795 = vmatpush3.bf16.msra.mxu0 %v7555_v4 }
 0x5f1   : > { %6322 = vmatprep.subr.mxu0 %v7145_v3 }
 0x5f3   : > { %6265 = vmatmul.mubr.msk.f32.vlgmr.msra.gmra.mrb[28].mxu0 %vm879_vm7, %v7783_v43 }
 0x5f4   : > { %6324 = vmatprep.mubr.msk.f32.mxu0 %vm7146_vm2, %v7145_v3 }
 0x5f9   : > { %6323 = vmatpush3.xpose.msk.msra.mxu0 %vm553_vm1, %v7252_v1 }
 0x5fa   : > { %6327 = vmatprep.subr.mxu0 %v7145_v3 }
 0x6a6   : > { %v2197_v48 = vpop.f32.mrb[24].mxu0 }
 0x6a7   : > { %v2271_v53 = vadd.f32 %v7752_v56, %v2197_v48  ;;  %v6192_v54 = vpop.f32.mrb[25].mxu0 }
 0x6a9   : > { %v2346_v30 = vadd.f32 %v7754_v62, %v2271_v53  ;;  %v2780_v62 = vadd.f32 %v7609_v16, %v7762_v23  ;;  %v3009_v23 = vstv %s3008_s23 }
 0x6aa   : > { %vm3010_vm10 = vcmp.eq.s32.totalorder %v3009_v23, 1 }
 0x6ab   : > { %v2347_v25 = vadd.f32 %v2346_v30, %v7594_v33 }
 0x6ad   : > { %v5621_v50 = vmul.f32 -1.442695, %v2347_v25 }
 0x6af   : > { %7055 = vpow2.f32 %v5621_v50 }
 0x6b6   : > { %v2420_v21 = vpop.f32.mrb[26].mxu0 }
 0x6b7   : > { %v2491_v6 = vadd.f32 %v7756_v7, %v2420_v21  ;;  %v6229_v57 = vpop.f32.mrb[27].mxu0 }
 0x6b9   : > { %v7056_v5 = vpop.eup %7055  ;;  %v2564_v10 = vadd.f32 %v7758_v8, %v2491_v6 }
 0x6ba   : > { %v2351_v1 = vadd.f32 1.0, %v7056_v5 }
 0x6bb   : > { %v2565_v12 = vadd.f32 %v2564_v10, %v7603_v0 }
 0x6bc   : > { %7057 = vrcp.f32 %v2351_v1 }
 0x6bd   : > { %v5625_v56 = vmul.f32 -1.442695, %v2565_v12 }
 0x6bf   : > { %7059 = vpow2.f32 %v5625_v56 }
 0x6c6   : > { %v7058_v18 = vpop.eup %7057  ;;  %v2638_v27 = vpop.f32.mrb[28].mxu0 }
 0x6c7   : > { %v2709_v29 = vadd.f32 %v7760_v17, %v2638_v27  ;;  %v2783_v32 = vmul.f32 %v7058_v18, %v2780_v62  ;;  %v6266_v7 = vpop.f32.mrb[29].mxu0 }
 0x6c9   : > { %v7060_v35 = vpop.eup %7059  ;;  %v2712_v48 = vadd.f32 %v7615_v20, %v2709_v29 }
 0x6ca   : > { %v2569_v8 = vadd.f32 1.0, %v7060_v35 }
 0x6cb   : > { %v2784_v53 = vadd.f32 %v2783_v32, %v2712_v48 }
 0x6cc   : > { %7061 = vrcp.f32 %v2569_v8 }
 0x6cd   : > { %7063 = vtanh.f32 %v2784_v53 }
 0x6d6   : > { %v7062_v54 = vpop.eup %7061 }
 0x6d7   : > { %v7064_v30 = vpop.eup %7063  ;;  %v2786_v25 = vsub.f32 1.0, %v7062_v54  ;;  %v2788_v21 = vmul.f32 %v7062_v54, %v7630_v2 }
 0x6d9   : > { %v2787_v50 = vmul.f32 %v7064_v30, %v2786_v25 }
 0x6db   : > { %v2789_v17 = vadd.f32 %v2788_v21, %v2787_v50 }
 0x6dd   : > { %6294 = vmatmul.mubr.msk.f32.vlgmr.msra.gmra.mrb[24].mxu1 %vm553_vm1, %v2789_v17  ;;  %v7830_v6 = vsel %vm3010_vm10, %v2789_v17, %v7630_v2 }
 0x6de   : > { %6813 = vmatpush3.bf16.msra.mxu1 %v7626_v60  ;;  %v3021_v57 = vrot.slane %v7830_v6, %v7268_v9  ;;  %6300 = vmatprep.mubr.msk.f32.mxu1 %vm7146_vm2, %v7145_v3 }
 0x6df   : > { %6814 = vmatprep.subr.bf16.mxu1 %v7148_v36 }
 0x6e0   : > { %v3029_v5 = vrot.slane %v3021_v57, %v7268_v9  ;;  %v3022_v10 = vcombine.high %v3021_v57, %v3021_v57 }
 0x6e2   : > { %6325 = vmatmul.mubr.msk.f32.vlgmr.msra.gmra.mrb[30].mxu0 %vm553_vm1, %v3029_v5  ;;  %v3036_v2 = vrot.slane %v3022_v10, %v7268_v9 }
 0x6e3   : > { %6328 = vmatpush3.xpose.msk.msra.mxu0 %vm553_vm1, %v7276_v13  ;;  %6329 = vmatprep.mubr.msk.f32.mxu0 %vm7146_vm2, %v7145_v3  ;;  %v7869_v13 = vld [vmem:[%s7238_s15 + $0x4] sm:$0x3] }
 0x6e4   : > { %6332 = vmatprep.subr.mxu0 %v7145_v3 }
 0x6e5   : > { %6301 = vmatmul.mubr.msk.f32.vlgmr.msra.gmra.mrb[24].mxu1 %vm952_vm5, %v7701_v42 }
 0x6e6   : > { %6816 = vmatpush3.bf16.msra.mxu1 %v7646_v15  ;;  %6330 = vmatmul.mubr.msk.f32.vlgmr.msra.gmra.mrb[32].mxu0 %vm553_vm1, %v3036_v2 }
 0x6e7   : > { %6817 = vmatprep.subr.bf16.mxu1 %v7148_v36  ;;  %6319 = vmatprep.mubr.msk.f32.mxu1 %vm7146_vm2, %v7145_v3 }
 0x6e8   : > { %6333 = vmatpush3.msra.mxu0 %v7298_v22  ;;  %6334 = vmatprep.mubr.msk.f32.mxu0 %vm7146_vm2, %v7145_v3 }
 0x6e9   : > { %6337 = vmatprep.subr.mxu0 %v7145_v3 }
 0x6ea   : > { %6819 = vmatpush3.bf16.msra.mxu1 %v7664_v26 }
 0x6eb   : > { %6820 = vmatprep.subr.bf16.mxu1 %v7148_v36 }
 0x6ee   : > { %6822 = vmatpush3.bf16.msra.mxu1 %v7680_v44 }
 0x6ef   : > { %6823 = vmatprep.subr.bf16.mxu1 %v7148_v36 }
 0x6f2   : > { %6825 = vmatpush3.bf16.msra.mxu1 %v7690_v38 }
 0x6f3   : > { %6838 = vmatprep.subr.bf16.mxu1 %v7148_v36 }
 0x6f5   : > { %6320 = vmatmul.mubr.msk.f32.vlgmr.msra.gmra.mrb[24].mxu1 %vm879_vm7, %v7783_v43 }
 0x6f6   : > { %6840 = vmatpush3.bf16.msra.mxu1 %v7320_v37  ;;  %6365 = vmatprep.mubr.msk.f32.mxu1 %vm7146_vm2, %v7145_v3 }
 0x6f7   : > { %6841 = vmatprep.subr.bf16.mxu1 %v7148_v36 }
 0x6f9   : > { %6366 = vmatmul.mubr.msk.f32.vlgmr.msra.gmra.mrb[26].mxu1 %vm952_vm5, %v7869_v13 }
 0x6fa   : > { %6843 = vmatpush3.bf16.msra.mxu1 %v7421_v19  ;;  %6376 = vmatprep.mubr.msk.f32.mxu1 %vm7146_vm2, %v7145_v3 }
 0x6fb   : > { %6844 = vmatprep.subr.bf16.mxu1 %v7148_v36 }
 0x6fe   : > { %6846 = vmatpush3.bf16.msra.mxu1 %v7445_v28 }
 0x6ff   : > { %6859 = vmatprep.subr.bf16.mxu1 %v7148_v36 }
 0x701   : > { %6377 = vmatmul.mubr.msk.f32.vlgmr.msra.gmra.mrb[28].mxu1 %vm553_vm1, %v7830_v6 }
 0x702   : > { %6861 = vmatpush3.bf16.msra.mxu1 %v7469_v34  ;;  %6402 = vmatprep.mubr.msk.f32.mxu1 %vm7146_vm2, %v7145_v3 }
 0x703   : > { %6862 = vmatprep.subr.bf16.mxu1 %v7148_v36 }
 0x705   : > { %6403 = vmatmul.mubr.msk.f32.vlgmr.msra.gmra.mrb[30].mxu1 %vm952_vm5, %v7869_v13 }
 0x706   : > { %6864 = vmatpush3.bf16.msra.mxu1 %v7491_v41  ;;  %6413 = vmatprep.mubr.msk.f32.mxu1 %vm7146_vm2, %v7145_v3 }
 0x707   : > { %6865 = vmatprep.subr.bf16.mxu1 %v7148_v36 }
 0x70a   : > { %6867 = vmatpush3.bf16.msra.mxu1 %v7505_v47 }
 0x70b   : > { %6880 = vmatprep.subr.bf16.mxu1 %v7148_v36 }
 0x70d   : > { %6414 = vmatmul.mubr.msk.f32.vlgmr.msra.gmra.mrb[32].mxu1 %vm553_vm1, %v7830_v6 }
 0x70e   : > { %6882 = vmatpush3.bf16.msra.mxu1 %v7429_v24  ;;  %6439 = vmatprep.mubr.msk.f32.mxu1 %vm7146_vm2, %v7145_v3 }
 0x70f   : > { %6883 = vmatprep.subr.bf16.mxu1 %v7148_v36 }
 0x711   : > { %6440 = vmatmul.mubr.msk.f32.vlgmr.msra.gmra.mrb[34].mxu1 %vm952_vm5, %v7869_v13 }
 0x712   : > { %6885 = vmatpush3.bf16.msra.mxu1 %v7457_v31  ;;  %6450 = vmatprep.mubr.msk.f32.mxu1 %vm7146_vm2, %v7145_v3 }
 0x713   : > { %6886 = vmatprep.subr.bf16.mxu1 %v7148_v36 }
 0x716   : > { %6888 = vmatpush3.bf16.msra.mxu1 %v7481_v39 }
 0x717   : > { %6889 = vmatprep.subr.bf16.mxu1 %v7148_v36 }
 0x719   : > { %6451 = vmatmul.mubr.msk.f32.vlgmr.msra.gmra.mrb[36].mxu1 %vm553_vm1, %v7830_v6 }
 0x71a   : > { %6891 = vmatpush3.bf16.msra.mxu1 %v7576_v11  ;;  %6461 = vmatprep.mubr.msk.f32.mxu1 %vm7146_vm2, %v7145_v3 }
 0x71b   : > { %6892 = vmatprep.subr.bf16.mxu1 %v7148_v36 }
 0x71e   : > { %6894 = vmatpush3.bf16.msra.mxu1 %v7582_v14 }
 0x71f   : > { %6895 = vmatprep.subr.bf16.mxu1 %v7148_v36 }
 0x7b5   : > { %v3105_v22 = vpop.f32.mrb[30].mxu0 }
 0x7b6   : > { %v6326_v42 = vpop.f32.mrb[31].mxu0  ;;  %v3181_v43 = vsel %vm704_vm3, %v3105_v22, -inf }
 0x7b7   : > { %3182 = vmax.xlane.f32.xlu0 %v3181_v43  ;;  %v7937_v43 = vld [vmem:[%s8225_s2 + $0x8] sm:$0xff] }
 0x7b9   : > { %v3177_v1 = vpop.f32.mrb[32].mxu0 }
 0x7ba   : > { %v6331_v12 = vpop.f32.mrb[33].mxu0  ;;  %v3184_v56 = vsel %vm704_vm3, %v3177_v1, -inf }
 0x7bb   : > { %3185 = vmax.xlane.f32.xlu1 %v3184_v56 }
 0x7c8   : > { %v2999_v62 = vpop.f32.mrb[24].mxu1 }
 0x7c9   : > { %5632 = vst.msk [vmem:[%s7243_s18 + $0x2] sm:$0x3] %vm1780_vm9, %v2999_v62  ;;  %v6321_v18 = vpop.f32.mrb[25].mxu1 }
 0x7cc   : > { %v7920_v27 = vpop.f32.mrb[26].mxu1 }
 0x7cd   : > { %v6367_v29 = vpop.f32.mrb[27].mxu1 }
 0x7d4   : > { %v7922_v32 = vpop.f32.mrb[28].mxu1 }
 0x7d5   : > { %v6378_v7 = vpop.f32.mrb[29].mxu1 }
 0x7d8   : > { %v7924_v35 = vpop.f32.mrb[30].mxu1 }
 0x7d9   : > { %v6404_v48 = vpop.f32.mrb[31].mxu1 }
 0x7e0   : > { %v7926_v8 = vpop.f32.mrb[32].mxu1 }
 0x7e1   : > { %v6415_v53 = vpop.f32.mrb[33].mxu1 }
 0x7e4   : > { %v7928_v54 = vpop.f32.mrb[34].mxu1 }
 0x7e5   : > { %v6441_v30 = vpop.f32.mrb[35].mxu1 }
 0x7ec   : > { %v7930_v25 = vpop.f32.mrb[36].mxu1 }
 0x7ed   : > { %v6452_v23 = vpop.f32.mrb[37].mxu1 }
 0x844   : > { %v3183_v50 = vpop.xlane.xlu0 %3182 }
 0x845   : > { %v3187_v21 = vsub.f32 %v3105_v22, %v3183_v50 }
 0x847   : > { %v3189_v17 = vmul.f32 1.442695, %v3187_v21 }
 0x848   : > { %v3186_v57 = vpop.xlane.xlu1 %3185 }
 0x849   : > { %7065 = vpow2.f32 %v3189_v17  ;;  %v3188_v5 = vsub.f32 %v3177_v1, %v3186_v57  ;;  %v7102_v17 = vld [vmem:[%s8224_s1] sm:$0xff] }
 0x84b   : > { %v3191_v10 = vmul.f32 1.442695, %v3188_v5 }
 0x84d   : > { %7067 = vpow2.f32 %v3191_v10 }
 0x853   : > { %v7066_v2 = vpop.eup %7065 }
 0x854   : > { %6335 = vmatmul.mubr.msk.f32.vlgmr.msra.gmra.mrb[34].mxu0 %vm723_vm4, %v7066_v2  ;;  %v3193_v42 = vsel %vm704_vm3, %v7066_v2, 0.0 }
 0x855   : > { %6338 = vmatpush3.msra.mxu0 %v7937_v43  ;;  %3194 = vadd.xlane.f32.xlu1 %v3193_v42 }
 0x856   : > { %6339 = vmatprep.mubr.msk.f32.mxu0 %vm7146_vm2, %v7145_v3  ;;  %6826 = vmatprep.subr.bf16.mxu0 %v7148_v36 }
 0x857   : > { %v7068_v22 = vpop.eup %7067 }
 0x858   : > { %6340 = vmatmul.mubr.msk.f32.vlgmr.msra.gmra.mrb[36].mxu0 %vm723_vm4, %v7068_v22  ;;  %v3196_v1 = vsel %vm704_vm3, %v7068_v22, 0.0 }
 0x859   : > { %3197 = vadd.xlane.f32.xlu0 %v3196_v1  ;;  %6828 = vmatpush3.bf16.msra.mxu0 %v7329_v40 }
 0x85a   : > { %6829 = vmatprep.subr.bf16.mxu0 %v7148_v36  ;;  %6358 = vmatprep.mubr.msk.f32.mxu0 %vm7146_vm2, %v7145_v3 }
 0x85d   : > { %6831 = vmatpush3.bf16.msra.mxu0 %v7348_v46 }
 0x85e   : > { %6832 = vmatprep.subr.bf16.mxu0 %v7148_v36 }
 0x861   : > { %6834 = vmatpush3.bf16.msra.mxu0 %v7375_v52 }
 0x862   : > { %6835 = vmatprep.subr.bf16.mxu0 %v7148_v36 }
 0x865   : > { %6837 = vmatpush3.bf16.msra.mxu0 %v7394_v58 }
 0x866   : > { %6847 = vmatprep.subr.bf16.mxu0 %v7148_v36 }
 0x8e2   : > { %v3195_v56 = vpop.xlane.xlu1 %3194 }
 0x8e6   : > { %v3198_v12 = vpop.xlane.xlu0 %3197 }
 0x8e7   : > { %7069 = vrcp.f32 %v3198_v12 }
 0x8e8   : > { %7071 = vrcp.f32 %v3195_v56 }
 0x8f1   : > { %v7070_v29 = vpop.eup %7069 }
 0x8f2   : > { %v7072_v30 = vpop.eup %7071 }
 0x927   : > { %v3268_v62 = vpop.f32.mrb[34].mxu0 }
 0x928   : > { %v6336_v18 = vpop.f32.mrb[35].mxu0  ;;  %v3346_v23 = vmul.f32 %v7072_v30, %v3268_v62 }
 0x92b   : > { %v3341_v7 = vpop.f32.mrb[36].mxu0 }
 0x92c   : > { %v3348_v48 = vmul.f32 %v7070_v29, %v3341_v7  ;;  %v6341_v53 = vpop.f32.mrb[37].mxu0 }
 0x92e   : > { %v3351_v50 = vrot.slane %v3348_v48, 7 }
 0x930   : > { %v7956_v21 = vsel %vm877_vm6, %v3351_v50, %v3346_v23 }
 0x931   : > { %6359 = vmatmul.mubr.msk.f32.vlgmr.msra.gmra.mrb[38].mxu0 %vm879_vm7, %v7956_v21 }
 0x932   : > { %6849 = vmatpush3.bf16.msra.mxu0 %v7344_v45  ;;  %6395 = vmatprep.mubr.msk.f32.mxu0 %vm7146_vm2, %v7145_v3 }
 0x933   : > { %6850 = vmatprep.subr.bf16.mxu0 %v7148_v36 }
 0x936   : > { %6852 = vmatpush3.bf16.msra.mxu0 %v7360_v49 }
 0x937   : > { %6853 = vmatprep.subr.bf16.mxu0 %v7148_v36 }
 0x93a   : > { %6855 = vmatpush3.bf16.msra.mxu0 %v7383_v55 }
 0x93b   : > { %6856 = vmatprep.subr.bf16.mxu0 %v7148_v36 }
 0x93e   : > { %6858 = vmatpush3.bf16.msra.mxu0 %v7403_v61 }
 0x93f   : > { %6868 = vmatprep.subr.bf16.mxu0 %v7148_v36 }
 0x941   : > { %6396 = vmatmul.mubr.msk.f32.vlgmr.msra.gmra.mrb[40].mxu0 %vm879_vm7, %v7956_v21 }
 0x942   : > { %6870 = vmatpush3.bf16.msra.mxu0 %v7521_v51  ;;  %6432 = vmatprep.mubr.msk.f32.mxu0 %vm7146_vm2, %v7145_v3 }
 0x943   : > { %6871 = vmatprep.subr.bf16.mxu0 %v7148_v36 }
 0x946   : > { %6873 = vmatpush3.bf16.msra.mxu0 %v7533_v59 }
 0x947   : > { %6874 = vmatprep.subr.bf16.mxu0 %v7148_v36 }
 0x94a   : > { %6876 = vmatpush3.bf16.msra.mxu0 %v7545_v63 }
 0x94b   : > { %6877 = vmatprep.subr.bf16.mxu0 %v7148_v36 }
 0x94e   : > { %6879 = vmatpush3.bf16.msra.mxu0 %v7555_v4 }
 0x94f   : > { %6490 = vmatprep.subr.mxu0 %v7145_v3 }
 0x951   : > { %6433 = vmatmul.mubr.msk.f32.vlgmr.msra.gmra.mrb[42].mxu0 %vm879_vm7, %v7956_v21 }
 0x952   : > { %6492 = vmatprep.mubr.msk.f32.mxu0 %vm7146_vm2, %v7145_v3 }
 0x957   : > { %6491 = vmatpush3.xpose.msk.msra.mxu0 %vm553_vm1, %v7102_v17 }
 0x958   : > { %6495 = vmatprep.subr.mxu0 %v7145_v3 }
 0xa04   : > { %v3421_v57 = vpop.f32.mrb[38].mxu0 }
 0xa05   : > { %v3495_v5 = vadd.f32 %v7920_v27, %v3421_v57  ;;  %v6360_v10 = vpop.f32.mrb[39].mxu0 }
 0xa07   : > { %v3570_v2 = vadd.f32 %v7922_v32, %v3495_v5  ;;  %v4004_v32 = vadd.f32 %v7609_v16, %v7930_v25  ;;  %v4233_v16 = vstv %s4232_s16 }
 0xa08   : > { %vm4234_vm11 = vcmp.eq.s32.totalorder %v4233_v16, 1 }
 0xa09   : > { %v3571_v42 = vadd.f32 %v3570_v2, %v7594_v33 }
 0xa0b   : > { %v5643_v22 = vmul.f32 -1.442695, %v3571_v42 }
 0xa0d   : > { %7073 = vpow2.f32 %v5643_v22 }
 0xa14   : > { %v3644_v1 = vpop.f32.mrb[40].mxu0 }
 0xa15   : > { %v3715_v12 = vadd.f32 %v7924_v35, %v3644_v1  ;;  %v6397_v56 = vpop.f32.mrb[41].mxu0 }
 0xa17   : > { %v7074_v62 = vpop.eup %7073  ;;  %v3788_v18 = vadd.f32 %v7926_v8, %v3715_v12 }
 0xa18   : > { %v3575_v29 = vadd.f32 1.0, %v7074_v62  ;;  %v7104_v62 = vld [vmem:[%s8225_s2] sm:$0xff] }
 0xa19   : > { %v3789_v7 = vadd.f32 %v3788_v18, %v7603_v0 }
 0xa1a   : > { %7075 = vrcp.f32 %v3575_v29 }
 0xa1b   : > { %v5647_v27 = vmul.f32 -1.442695, %v3789_v7 }
 0xa1d   : > { %7077 = vpow2.f32 %v5647_v27 }
 0xa24   : > { %v7076_v48 = vpop.eup %7075  ;;  %v3862_v53 = vpop.f32.mrb[42].mxu0 }
 0xa25   : > { %v3933_v30 = vadd.f32 %v7928_v54, %v3862_v53  ;;  %v4007_v23 = vmul.f32 %v7076_v48, %v4004_v32  ;;  %v6434_v35 = vpop.f32.mrb[43].mxu0 }
 0xa27   : > { %v7078_v50 = vpop.eup %7077  ;;  %v3936_v17 = vadd.f32 %v7615_v20, %v3933_v30 }
 0xa28   : > { %v3793_v8 = vadd.f32 1.0, %v7078_v50 }
 0xa29   : > { %v4008_v57 = vadd.f32 %v4007_v23, %v3936_v17 }
 0xa2a   : > { %7079 = vrcp.f32 %v3793_v8 }
 0xa2b   : > { %7081 = vtanh.f32 %v4008_v57 }
 0xa34   : > { %v7080_v5 = vpop.eup %7079 }
 0xa35   : > { %v7082_v10 = vpop.eup %7081  ;;  %v4010_v2 = vsub.f32 1.0, %v7080_v5  ;;  %v4012_v42 = vmul.f32 %v7080_v5, %v7830_v6 }
 0xa37   : > { %v4011_v25 = vmul.f32 %v7082_v10, %v4010_v2 }
 0xa39   : > { %v4013_v54 = vadd.f32 %v4012_v42, %v4011_v25 }
 0xa3b   : > { %6462 = vmatmul.mubr.msk.f32.vlgmr.msra.gmra.mrb[38].mxu1 %vm553_vm1, %v4013_v54  ;;  %v8005_v20 = vsel %vm4234_vm11, %v4013_v54, %v7830_v6  ;;  %v7103_v6 = vld [vmem:[%s8224_s1 + $0x8] sm:$0xff] }
 0xa3c   : > { %6897 = vmatpush3.bf16.msra.mxu1 %v7626_v60  ;;  %v4245_v22 = vrot.slane %v8005_v20, %v7268_v9  ;;  %6468 = vmatprep.mubr.msk.f32.mxu1 %vm7146_vm2, %v7145_v3 }
 0xa3d   : > { %6898 = vmatprep.subr.bf16.mxu1 %v7148_v36 }
 0xa3e   : > { %v4253_v1 = vrot.slane %v4245_v22, %v7268_v9  ;;  %v4246_v12 = vcombine.high %v4245_v22, %v4245_v22 }
 0xa40   : > { %6493 = vmatmul.mubr.msk.f32.vlgmr.msra.gmra.mrb[44].mxu0 %vm553_vm1, %v4253_v1  ;;  %v4260_v56 = vrot.slane %v4246_v12, %v7268_v9  ;;  %v8048_v9 = vld [vmem:[%s7238_s15 + $0x6] sm:$0x3] }
 0xa41   : > { %6496 = vmatpush3.xpose.msk.msra.mxu0 %vm553_vm1, %v7103_v6  ;;  %6497 = vmatprep.mubr.msk.f32.mxu0 %vm7146_vm2, %v7145_v3 }
 0xa42   : > { %6500 = vmatprep.subr.mxu0 %v7145_v3 }
 0xa43   : > { %6469 = vmatmul.mubr.msk.f32.vlgmr.msra.gmra.mrb[38].mxu1 %vm952_vm5, %v7869_v13 }
 0xa44   : > { %6900 = vmatpush3.bf16.msra.mxu1 %v7646_v15  ;;  %6498 = vmatmul.mubr.msk.f32.vlgmr.msra.gmra.mrb[46].mxu0 %vm553_vm1, %v4260_v56 }
 0xa45   : > { %6901 = vmatprep.subr.bf16.mxu1 %v7148_v36  ;;  %6487 = vmatprep.mubr.msk.f32.mxu1 %vm7146_vm2, %v7145_v3 }
 0xa46   : > { %6501 = vmatpush3.msra.mxu0 %v7104_v62  ;;  %6502 = vmatprep.mubr.msk.f32.mxu0 %vm7146_vm2, %v7145_v3 }
 0xa47   : > { %6505 = vmatprep.subr.mxu0 %v7145_v3 }
 0xa48   : > { %6903 = vmatpush3.bf16.msra.mxu1 %v7664_v26 }
 0xa49   : > { %6904 = vmatprep.subr.bf16.mxu1 %v7148_v36 }
 0xa4c   : > { %6906 = vmatpush3.bf16.msra.mxu1 %v7680_v44 }
 0xa4d   : > { %6907 = vmatprep.subr.bf16.mxu1 %v7148_v36 }
 0xa50   : > { %6909 = vmatpush3.bf16.msra.mxu1 %v7690_v38 }
 0xa51   : > { %6922 = vmatprep.subr.bf16.mxu1 %v7148_v36 }
 0xa53   : > { %6488 = vmatmul.mubr.msk.f32.vlgmr.msra.gmra.mrb[38].mxu1 %vm879_vm7, %v7956_v21 }
 0xa54   : > { %6924 = vmatpush3.bf16.msra.mxu1 %v7320_v37  ;;  %6533 = vmatprep.mubr.msk.f32.mxu1 %vm7146_vm2, %v7145_v3 }
 0xa55   : > { %6925 = vmatprep.subr.bf16.mxu1 %v7148_v36 }
 0xa57   : > { %6534 = vmatmul.mubr.msk.f32.vlgmr.msra.gmra.mrb[40].mxu1 %vm952_vm5, %v8048_v9 }
 0xa58   : > { %6927 = vmatpush3.bf16.msra.mxu1 %v7421_v19  ;;  %6544 = vmatprep.mubr.msk.f32.mxu1 %vm7146_vm2, %v7145_v3 }
 0xa59   : > { %6928 = vmatprep.subr.bf16.mxu1 %v7148_v36 }
 0xa5c   : > { %6930 = vmatpush3.bf16.msra.mxu1 %v7445_v28 }
 0xa5d   : > { %6943 = vmatprep.subr.bf16.mxu1 %v7148_v36 }
 0xa5f   : > { %6545 = vmatmul.mubr.msk.f32.vlgmr.msra.gmra.mrb[42].mxu1 %vm553_vm1, %v8005_v20 }
 0xa60   : > { %6945 = vmatpush3.bf16.msra.mxu1 %v7469_v34  ;;  %6570 = vmatprep.mubr.msk.f32.mxu1 %vm7146_vm2, %v7145_v3 }
 0xa61   : > { %6946 = vmatprep.subr.bf16.mxu1 %v7148_v36 }
 0xa63   : > { %6571 = vmatmul.mubr.msk.f32.vlgmr.msra.gmra.mrb[44].mxu1 %vm952_vm5, %v8048_v9 }
 0xa64   : > { %6948 = vmatpush3.bf16.msra.mxu1 %v7491_v41  ;;  %6581 = vmatprep.mubr.msk.f32.mxu1 %vm7146_vm2, %v7145_v3 }
 0xa65   : > { %6949 = vmatprep.subr.bf16.mxu1 %v7148_v36 }
 0xa68   : > { %6951 = vmatpush3.bf16.msra.mxu1 %v7505_v47 }
 0xa69   : > { %6964 = vmatprep.subr.bf16.mxu1 %v7148_v36 }
 0xa6b   : > { %6582 = vmatmul.mubr.msk.f32.vlgmr.msra.gmra.mrb[46].mxu1 %vm553_vm1, %v8005_v20 }
 0xa6c   : > { %6966 = vmatpush3.bf16.msra.mxu1 %v7429_v24  ;;  %6607 = vmatprep.mubr.msk.f32.mxu1 %vm7146_vm2, %v7145_v3 }
 0xa6d   : > { %6967 = vmatprep.subr.bf16.mxu1 %v7148_v36 }
 0xa6f   : > { %6608 = vmatmul.mubr.msk.f32.vlgmr.msra.gmra.mrb[48].mxu1 %vm952_vm5, %v8048_v9 }
 0xa70   : > { %6969 = vmatpush3.bf16.msra.mxu1 %v7457_v31  ;;  %6618 = vmatprep.mubr.msk.f32.mxu1 %vm7146_vm2, %v7145_v3 }
 0xa71   : > { %6970 = vmatprep.subr.bf16.mxu1 %v7148_v36 }
 0xa74   : > { %6972 = vmatpush3.bf16.msra.mxu1 %v7481_v39 }
 0xa75   : > { %6973 = vmatprep.subr.bf16.mxu1 %v7148_v36 }
 0xa77   : > { %6619 = vmatmul.mubr.msk.f32.vlgmr.msra.gmra.mrb[50].mxu1 %vm553_vm1, %v8005_v20 }
 0xa78   : > { %6975 = vmatpush3.bf16.msra.mxu1 %v7576_v11  ;;  %6629 = vmatprep.mubr.msk.f32.mxu1 %vm7146_vm2, %v7145_v3 }
 0xa79   : > { %6976 = vmatprep.subr.bf16.mxu1 %v7148_v36 }
 0xa7c   : > { %6978 = vmatpush3.bf16.msra.mxu1 %v7582_v14 }
 0xa7d   : > { %6979 = vmatprep.subr.bf16.mxu1 %v7148_v36 }
 0xb13   : > { %v4329_v37 = vpop.f32.mrb[44].mxu0 }
 0xb14   : > { %v6494_v19 = vpop.f32.mrb[45].mxu0  ;;  %v4405_v24 = vsel %vm704_vm3, %v4329_v37, -inf }
 0xb15   : > { %4406 = vmax.xlane.f32.xlu0 %v4405_v24 }
 0xb17   : > { %v4401_v28 = vpop.f32.mrb[46].mxu0 }
 0xb18   : > { %v6499_v31 = vpop.f32.mrb[47].mxu0  ;;  %v4408_v34 = vsel %vm704_vm3, %v4401_v28, -inf }
 0xb19   : > { %4409 = vmax.xlane.f32.xlu1 %v4408_v34 }
 0xb26   : > { %v4223_v39 = vpop.f32.mrb[38].mxu1 }
 0xb27   : > { %5654 = vst.msk [vmem:[%s7243_s18 + $0x4] sm:$0x3] %vm1780_vm9, %v4223_v39  ;;  %v6489_v41 = vpop.f32.mrb[39].mxu1 }
 0xb2a   : > { %v8099_v47 = vpop.f32.mrb[40].mxu1 }
 0xb2b   : > { %v6535_v11 = vpop.f32.mrb[41].mxu1 }
 0xb32   : > { %v8101_v14 = vpop.f32.mrb[42].mxu1 }
 0xb33   : > { %v6546_v13 = vpop.f32.mrb[43].mxu1 }
 0xb36   : > { %v8103_v21 = vpop.f32.mrb[44].mxu1 }
 0xb37   : > { %v6572_v18 = vpop.f32.mrb[45].mxu1 }
 0xb3e   : > { %v8105_v29 = vpop.f32.mrb[46].mxu1 }
 0xb3f   : > { %v6583_v7 = vpop.f32.mrb[47].mxu1 }
 0xb42   : > { %v8107_v27 = vpop.f32.mrb[48].mxu1 }
 0xb43   : > { %v6609_v32 = vpop.f32.mrb[49].mxu1 }
 0xb44   : > { %v5457_v32 = vstv %s5456_s29 }
 0xb45   : > { %vm5458_vm12 = vcmp.eq.s32.totalorder %v5457_v32, 1 }
 0xb4a   : > { %v8109_v48 = vpop.f32.mrb[50].mxu1 }
 0xb4b   : > { %v6620_v53 = vpop.f32.mrb[51].mxu1 }
 0xba2   : > { %v4407_v30 = vpop.xlane.xlu0 %4406 }
 0xba3   : > { %v4411_v23 = vsub.f32 %v4329_v37, %v4407_v30 }
 0xba5   : > { %v4413_v35 = vmul.f32 1.442695, %v4411_v23 }
 0xba6   : > { %v4410_v50 = vpop.xlane.xlu1 %4409 }
 0xba7   : > { %7083 = vpow2.f32 %v4413_v35  ;;  %v4412_v17 = vsub.f32 %v4401_v28, %v4410_v50 }
 0xba9   : > { %v4415_v8 = vmul.f32 1.442695, %v4412_v17 }
 0xbab   : > { %7085 = vpow2.f32 %v4415_v8 }
 0xbb1   : > { %v7084_v57 = vpop.eup %7083 }
 0xbb2   : > { %6503 = vmatmul.mubr.msk.f32.vlgmr.msra.gmra.mrb[48].mxu0 %vm723_vm4, %v7084_v57  ;;  %v4417_v5 = vsel %vm704_vm3, %v7084_v57, 0.0 }
 0xbb3   : > { %6506 = vmatpush3.msra.mxu0 %v7937_v43  ;;  %4418 = vadd.xlane.f32.xlu1 %v4417_v5 }
 0xbb4   : > { %6507 = vmatprep.mubr.msk.f32.mxu0 %vm7146_vm2, %v7145_v3  ;;  %6910 = vmatprep.subr.bf16.mxu0 %v7148_v36 }
 0xbb5   : > { %v7086_v10 = vpop.eup %7085 }
 0xbb6   : > { %6508 = vmatmul.mubr.msk.f32.vlgmr.msra.gmra.mrb[50].mxu0 %vm723_vm4, %v7086_v10  ;;  %v4420_v2 = vsel %vm704_vm3, %v7086_v10, 0.0 }
 0xbb7   : > { %4421 = vadd.xlane.f32.xlu0 %v4420_v2  ;;  %6912 = vmatpush3.bf16.msra.mxu0 %v7329_v40 }
 0xbb8   : > { %6913 = vmatprep.subr.bf16.mxu0 %v7148_v36  ;;  %6526 = vmatprep.mubr.msk.f32.mxu0 %vm7146_vm2, %v7145_v3 }
 0xbbb   : > { %6915 = vmatpush3.bf16.msra.mxu0 %v7348_v46 }
 0xbbc   : > { %6916 = vmatprep.subr.bf16.mxu0 %v7148_v36 }
 0xbbf   : > { %6918 = vmatpush3.bf16.msra.mxu0 %v7375_v52 }
 0xbc0   : > { %6919 = vmatprep.subr.bf16.mxu0 %v7148_v36 }
 0xbc3   : > { %6921 = vmatpush3.bf16.msra.mxu0 %v7394_v58 }
 0xbc4   : > { %6931 = vmatprep.subr.bf16.mxu0 %v7148_v36 }
 0xc40   : > { %v4419_v16 = vpop.xlane.xlu1 %4418 }
 0xc44   : > { %v4422_v43 = vpop.xlane.xlu0 %4421 }
 0xc45   : > { %7087 = vrcp.f32 %v4422_v43 }
 0xc46   : > { %7089 = vrcp.f32 %v4419_v16 }
 0xc4f   : > { %v7088_v42 = vpop.eup %7087 }
 0xc50   : > { %v7090_v1 = vpop.eup %7089 }
 0xc85   : > { %v4492_v40 = vpop.f32.mrb[48].mxu0 }
 0xc86   : > { %v6504_v25 = vpop.f32.mrb[49].mxu0  ;;  %v4570_v12 = vmul.f32 %v7090_v1, %v4492_v40 }
 0xc89   : > { %v4565_v54 = vpop.f32.mrb[50].mxu0 }
 0xc8a   : > { %v4572_v22 = vmul.f32 %v7088_v42, %v4565_v54  ;;  %v6509_v46 = vpop.f32.mrb[51].mxu0 }
 0xc8c   : > { %v4575_v6 = vrot.slane %v4572_v22, 7 }
 0xc8e   : > { %v8130_v52 = vsel %vm877_vm6, %v4575_v6, %v4570_v12 }
 0xc8f   : > { %6527 = vmatmul.mubr.msk.f32.vlgmr.msra.gmra.mrb[52].mxu0 %vm879_vm7, %v8130_v52 }
 0xc90   : > { %6933 = vmatpush3.bf16.msra.mxu0 %v7344_v45  ;;  %6563 = vmatprep.mubr.msk.f32.mxu0 %vm7146_vm2, %v7145_v3 }
 0xc91   : > { %6934 = vmatprep.subr.bf16.mxu0 %v7148_v36 }
 0xc94   : > { %6936 = vmatpush3.bf16.msra.mxu0 %v7360_v49 }
 0xc95   : > { %6937 = vmatprep.subr.bf16.mxu0 %v7148_v36 }
 0xc98   : > { %6939 = vmatpush3.bf16.msra.mxu0 %v7383_v55 }
 0xc99   : > { %6940 = vmatprep.subr.bf16.mxu0 %v7148_v36 }
 0xc9c   : > { %6942 = vmatpush3.bf16.msra.mxu0 %v7403_v61 }
 0xc9d   : > { %6952 = vmatprep.subr.bf16.mxu0 %v7148_v36 }
 0xc9f   : > { %6564 = vmatmul.mubr.msk.f32.vlgmr.msra.gmra.mrb[54].mxu0 %vm879_vm7, %v8130_v52 }
 0xca0   : > { %6954 = vmatpush3.bf16.msra.mxu0 %v7521_v51  ;;  %6600 = vmatprep.mubr.msk.f32.mxu0 %vm7146_vm2, %v7145_v3 }
 0xca1   : > { %6955 = vmatprep.subr.bf16.mxu0 %v7148_v36 }
 0xca4   : > { %6957 = vmatpush3.bf16.msra.mxu0 %v7533_v59 }
 0xca5   : > { %6958 = vmatprep.subr.bf16.mxu0 %v7148_v36 }
 0xca8   : > { %6960 = vmatpush3.bf16.msra.mxu0 %v7545_v63 }
 0xca9   : > { %6961 = vmatprep.subr.bf16.mxu0 %v7148_v36 }
 0xcac   : > { %6963 = vmatpush3.bf16.msra.mxu0 %v7555_v4 }
 0xcaf   : > { %6601 = vmatmul.mubr.msk.f32.vlgmr.msra.gmra.mrb[56].mxu0 %vm879_vm7, %v8130_v52 }
 0xd62   : > { %v4645_v45 = vpop.f32.mrb[52].mxu0 }
 0xd63   : > { %v4719_v49 = vadd.f32 %v8099_v47, %v4645_v45  ;;  %v6528_v55 = vpop.f32.mrb[53].mxu0 }
 0xd65   : > { %v4794_v58 = vadd.f32 %v8101_v14, %v4719_v49 }
 0xd67   : > { %v4795_v61 = vadd.f32 %v4794_v58, %v7594_v33  ;;  %v7105_v33 = vld [vmem:[%s8231_s8 + $0x2] ss:$0 sm:$0xff] }
 0xd68   : > { %v5228_v28 = vadd.f32 %v7105_v33, %v8109_v48 }
 0xd69   : > { %v5665_v51 = vmul.f32 -1.442695, %v4795_v61 }
 0xd6b   : > { %7091 = vpow2.f32 %v5665_v51 }
 0xd72   : > { %v4868_v59 = vpop.f32.mrb[54].mxu0 }
 0xd73   : > { %v4939_v63 = vadd.f32 %v8103_v21, %v4868_v59  ;;  %v6565_v56 = vpop.f32.mrb[55].mxu0 }
 0xd75   : > { %v7092_v62 = vpop.eup %7091  ;;  %v5012_v4 = vadd.f32 %v8105_v29, %v4939_v63 }
 0xd76   : > { %v4799_v37 = vadd.f32 1.0, %v7092_v62 }
 0xd77   : > { %v5013_v19 = vadd.f32 %v5012_v4, %v7603_v0  ;;  %v7106_v0 = vld [vmem:[%s8230_s7 + $0x2] ss:$0 sm:$0xff] }
 0xd78   : > { %7093 = vrcp.f32 %v4799_v37 }
 0xd79   : > { %v5669_v24 = vmul.f32 -1.442695, %v5013_v19 }
 0xd7b   : > { %7095 = vpow2.f32 %v5669_v24 }
 0xd82   : > { %v7094_v31 = vpop.eup %7093  ;;  %v5086_v34 = vpop.f32.mrb[56].mxu0 }
 0xd83   : > { %v5157_v39 = vadd.f32 %v8107_v27, %v5086_v34  ;;  %v5231_v41 = vmul.f32 %v7094_v31, %v5228_v28  ;;  %v6602_v47 = vpop.f32.mrb[57].mxu0 }
 0xd85   : > { %v7096_v11 = vpop.eup %7095  ;;  %v5160_v14 = vadd.f32 %v7106_v0, %v5157_v39 }
 0xd86   : > { %v5017_v13 = vadd.f32 1.0, %v7096_v11 }
 0xd87   : > { %v5232_v21 = vadd.f32 %v5231_v41, %v5160_v14 }
 0xd88   : > { %7097 = vrcp.f32 %v5017_v13 }
 0xd89   : > { %7099 = vtanh.f32 %v5232_v21 }
 0xd92   : > { %v7098_v18 = vpop.eup %7097 }
 0xd93   : > { %v7100_v29 = vpop.eup %7099  ;;  %v5234_v7 = vsub.f32 1.0, %v7098_v18  ;;  %v5236_v48 = vmul.f32 %v7098_v18, %v8005_v20 }
 0xd95   : > { %v5235_v27 = vmul.f32 %v7100_v29, %v5234_v7 }
 0xd97   : > { %v5237_v53 = vadd.f32 %v5236_v48, %v5235_v27 }
 0xd99   : > { %6630 = vmatmul.mubr.msk.f32.vlgmr.msra.gmra.mrb[52].mxu1 %vm553_vm1, %v5237_v53  ;;  %v5459_v30 = vsel %vm5458_vm12, %v5237_v53, %v8005_v20 }
 0xd9a   : > { %5460 = vst.msk [vmem:[#allocation2] sm:$0x3] %vm1780_vm9, %v5459_v30  ;;  %6981 = vmatpush3.bf16.msra.mxu1 %v7626_v60  ;;  %6636 = vmatprep.mubr.msk.f32.mxu1 %vm7146_vm2, %v7145_v3  ;;  %5465 = vst.msk [vmem:[#allocation3] sm:$0x3] (!%p5677_p9), %vm1780_vm9, %v5459_v30 }
 0xd9b   : > { %6982 = vmatprep.subr.bf16.mxu1 %v7148_v36 }
 0xda1   : > { %6637 = vmatmul.mubr.msk.f32.vlgmr.msra.gmra.mrb[52].mxu1 %vm952_vm5, %v8048_v9 }
 0xda2   : > { %6984 = vmatpush3.bf16.msra.mxu1 %v7646_v15  ;;  %6655 = vmatprep.mubr.msk.f32.mxu1 %vm7146_vm2, %v7145_v3 }
 0xda3   : > { %6985 = vmatprep.subr.bf16.mxu1 %v7148_v36 }
 0xda6   : > { %6987 = vmatpush3.bf16.msra.mxu1 %v7664_v26 }
 0xda7   : > { %6988 = vmatprep.subr.bf16.mxu1 %v7148_v36 }
 0xdaa   : > { %6990 = vmatpush3.bf16.msra.mxu1 %v7680_v44 }
 0xdab   : > { %6991 = vmatprep.subr.bf16.mxu1 %v7148_v36 }
 0xdae   : > { %6993 = vmatpush3.bf16.msra.mxu1 %v7690_v38 }
 0xdb1   : > { %6656 = vmatmul.mubr.msk.f32.vlgmr.msra.gmra.mrb[52].mxu1 %vm879_vm7, %v8130_v52 }
 0xe7f   : > { %5464 = sbr.rel (%p5677_p9) target bundleno = 3718 (0xe86), region = 76 }
 0xe84   : > { %v5447_v60 = vpop.f32.mrb[52].mxu1 }
 0xe85   : > { %5676 = vst.msk [vmem:[%s7243_s18 + $0x6] sm:$0x3] %vm1780_vm9, %v5447_v60  ;;  %v6657_v15 = vpop.f32.mrb[53].mxu1 }
 0xe86 PF: > { %p7014_p10 = scmp.eq.s32.totalorder %s7226_s26, 1  ;;  %s7149_s27 = smov [#allocation3]  }
 0xe87   : > { %s5482_s30 = sshll.u32 %s7149_s27, 4  ;;  %s5483_s30 = int_to_ptr.vmem [resolvable:$true] %s5482_s30 }
 0xe88   : > { %s7107_s14 = scalar_lea.vmem %s5483_s30, 32  ;;  %p7114_p0 = scmp.lt.s32.totalorder %s5483_s30, %s5483_s30 }
 0xe89   : > { %p7108_p11 = scmp.ne.s32.totalorder %s5483_s30, %s7107_s14  ;;  %p7115_p1 = scmp.lt.s32.totalorder %s7107_s14, %s7107_s14 }
 0xe8b   : > { %p7109_p12 = pnand %p7108_p11, %p7014_p10  ;;  %p7116_p2 = por %p7115_p1, %p7114_p0 }
 0xe8d   : > { %p7110_p13 = pneg %p7109_p12 }
 0xe8f   : > { %p7117_p3 = pnand %p7116_p2, %p7110_p13 }
 0xe91   : > { %7120 = shalt.err (!%p7117_p3)
}
 0xe92   : > { %s7121_s17 = scalar_lea.hbm %s8236_s13, 32 }
 0xe93   : > { %p7122_p4 = scmp.ne.s32.totalorder %s8236_s13, %s7121_s17  ;;  %p7127_p7 = scmp.lt.u32.totalorder %s7121_s17, %s8236_s13 }
 0xe95   : > { %p7123_p5 = pnand %p7122_p4, %p7014_p10 }
 0xe97   : > { %p7124_p6 = pneg %p7123_p5 }
 0xe99   : > { %p7129_p8 = pnand %p7127_p7, %p7124_p6 }
 0xe9b   : > { %7132 = shalt.err (!%p7129_p8)
}
 0xe9c   : > { %7011 = dma.vmem_to_hbm [thread:$0]  (%p7014_p10), %s5483_s30, 32, %s8236_s13, [#allocation4]  }
 0xe9d   : > { %7138 = dma.done.wait (%p7014_p10), [#allocation4], 32  }
 0xe9e   : > { %7140 = vsyncadd (%p7014_p10), [#allocation4], 4294967264 }
 0xe9f PF: > { %s25_s25 = sadd.s32 1, %s7143_s25  }
 0xea0   : > { %p22_p9 = scmp.ge.s32.totalorder %s25_s25, 4  }
 0xea2   :  { %24 = sbr.rel (!%p22_p9) target bundleno = 1 (0x1), region = 131 }
 0xea9   :  { %5503 = vsyncpa [#allocation4], 1 }
 0xeaa   :  { %5505 = vsyncpa [#allocation4 + $0x1], 1 }

</bundles_post_ra>
